<compile_context>
chip_gen: v6e
topology: v6e:2x2x1
jax: 0.10.0
libtpu: 0.0.40
codegen_flags: <defaults>
</compile_context>

<pallas_src>
import jax
import jax.numpy as jnp
from jax import lax
from jax.experimental import pallas as pl
from jax.experimental.pallas import tpu as pltpu

# ----------------------------- configuration ------------------------------ #
B = 2            # batch
S = 8            # sequence length
H = 32           # hidden size
N_HEADS = 4
DH = H // N_HEADS
FF = 64          # intermediate (4*H scaled down)
N_LAYERS = 2
VOCAB = 100
VPAD = 128       # vocab padded to one lane tile
N_TYPES = 2
N_CLASSES = 4
LN_EPS = 1e-12   # BERT layernorm eps
DTYPE = jnp.float32
BS = B * S
NEG = -10000.0   # BERT extended-attention-mask bias
OUT_ROWS = 8     # lane/sublane-dense padded logits tile
OUT_COLS = 128

# gslab row offsets (all multiples of 8 -> free sublane-group slices in-kernel)
G_POS = 0                 # (BS, H)  position + token_type embedding rows
G_VEC = G_POS + BS        # 16: rows [emb_ln_g, emb_ln_b, pooler_b, out_b, 4x zero pad]
G_BIAS = G_VEC + 8        # 24: (BS, BS) additive attention bias
G_CLS = G_BIAS + BS       # 40: (8, BS) CLS-row selector (rows >= B are zero)
G_POOLW = G_CLS + 8       # 48: (H, H)  pooler weight
G_OUTW = G_POOLW + H      # 80: (H, 128) classifier weight (cols >= N_CLASSES zero)
G_EMB = G_OUTW + H        # 112: (VPAD, H) word-embedding table (rows >= VOCAB zero)
G_ROWS = G_EMB + VPAD     # 240

# lslab row offsets (within each layer slab, width 3H)
L_VEC = 0                 # rows 0..7: [bqkv, bo, ln1g, ln1b, b1, b2, ln2g, ln2b]
L_WQKV = 8                # (H, 3H)
L_WO = L_WQKV + H         # 40: (H, H)
L_W1 = L_WO + H           # 72: (H, FF)
L_W2 = L_W1 + H           # 104: (FF, H)
L_ROWS = L_W2 + FF        # 168


def _full_spec(shape):
    # one full-array block (grid has a single step)
    return pl.BlockSpec(shape, lambda i: (0,) * len(shape))


# --------------------------- in-kernel helpers ----------------------------- #
def _ln(x, g, b):
    mean = jnp.mean(x, axis=-1, keepdims=True)
    var = jnp.mean((x - mean) ** 2, axis=-1, keepdims=True)
    return (x - mean) * lax.rsqrt(var + LN_EPS) * g + b


def _gelu_tanh(x):
    # TODO(synk): HF BERT default is exact erf-GELU; tanh approximation used here.
    c = 0.7978845608028654  # sqrt(2/pi)
    return 0.5 * x * (1.0 + jnp.tanh(c * (x + 0.044715 * x * x * x)))


# ------------------------------ fused kernel ------------------------------- #
def _fused_forward_kernel(ids_ref, gslab_ref, lslab_ref, out_ref):
    f32 = jnp.float32

    # ---- embeddings: one-hot gather on the MXU (vocab padded to one 128-lane tile) ----
    ids = ids_ref[...]                                            # (BS, 1) int32
    iota = lax.broadcasted_iota(jnp.int32, (BS, VPAD), 1)
    onehot = jnp.where(iota == ids, 1.0, 0.0).astype(f32)         # (BS, VPAD)
    word_emb = gslab_ref[G_EMB:G_EMB + VPAD, :H]                  # (VPAD, H)
    h = jnp.dot(onehot, word_emb, preferred_element_type=f32)
    h = h + gslab_ref[G_POS:G_POS + BS, :H]                       # pos + token_type rows
    h = _ln(h, gslab_ref[G_VEC + 0:G_VEC + 1, :H],
            gslab_ref[G_VEC + 1:G_VEC + 2, :H])

    bias = gslab_ref[G_BIAS:G_BIAS + BS, :BS]                     # (BS, BS) additive mask
    scale = 1.0 / (DH ** 0.5)

    # ---- encoder stack, fully unrolled (2 layers), all weights VMEM-resident ----
    for l in range(N_LAYERS):
        # fused QKV projection: one (BS,H) x (H,3H) MXU pass
        wqkv = lslab_ref[l, L_WQKV:L_WQKV + H, :]                 # (H, 3H)
        bqkv = lslab_ref[l, L_VEC + 0:L_VEC + 1, :]               # (1, 3H)
        qkv = jnp.dot(h, wqkv, preferred_element_type=f32) + bqkv

        # one K transpose per layer; per-head K^T tiles are free sublane slices of kT
        kT = qkv[:, H:2 * H].T                                    # (H, BS)

        ctx_parts = []                                            # kept in registers
        for hd in range(N_HEADS):
            q_h = qkv[:, hd * DH:(hd + 1) * DH]                   # (BS, DH)
            kT_h = kT[hd * DH:(hd + 1) * DH, :]                   # (DH, BS) sublane slice
            v_h = qkv[:, 2 * H + hd * DH:2 * H + (hd + 1) * DH]   # (BS, DH)
            s = jnp.dot(q_h, kT_h, preferred_element_type=f32) * scale + bias
            m = jnp.max(s, axis=-1, keepdims=True)
            p = jnp.exp(s - m)
            denom = jnp.sum(p, axis=-1, keepdims=True)
            p = p * pl.reciprocal(denom, approx=True)             # EUP, not VPU divide
            ctx_parts.append(jnp.dot(p, v_h, preferred_element_type=f32))
        ctx = jnp.concatenate(ctx_parts, axis=-1)                 # (BS, H), no scratch

        wo = lslab_ref[l, L_WO:L_WO + H, :H]
        attn_out = (jnp.dot(ctx, wo, preferred_element_type=f32)
                    + lslab_ref[l, L_VEC + 1:L_VEC + 2, :H])
        h = _ln(h + attn_out,
                lslab_ref[l, L_VEC + 2:L_VEC + 3, :H],
                lslab_ref[l, L_VEC + 3:L_VEC + 4, :H])            # residual fused into LN

        w1 = lslab_ref[l, L_W1:L_W1 + H, :FF]
        ff = (jnp.dot(h, w1, preferred_element_type=f32)
              + lslab_ref[l, L_VEC + 4:L_VEC + 5, :FF])
        ff = _gelu_tanh(ff)
        w2 = lslab_ref[l, L_W2:L_W2 + FF, :H]
        ff = (jnp.dot(ff, w2, preferred_element_type=f32)
              + lslab_ref[l, L_VEC + 5:L_VEC + 6, :H])
        h = _ln(h + ff,
                lslab_ref[l, L_VEC + 6:L_VEC + 7, :H],
                lslab_ref[l, L_VEC + 7:L_VEC + 8, :H])            # residual fused into LN

    # ---- pooler on [CLS] rows; 8-row selector keeps everything sublane/lane dense ----
    cls_sel = gslab_ref[G_CLS:G_CLS + OUT_ROWS, :BS]              # (8, BS); rows >= B zero
    cls = jnp.dot(cls_sel, h, preferred_element_type=f32)         # (8, H)
    pool_w = gslab_ref[G_POOLW:G_POOLW + H, :H]
    pooled = jnp.tanh(jnp.dot(cls, pool_w, preferred_element_type=f32)
                      + gslab_ref[G_VEC + 2:G_VEC + 3, :H])

    # dropout(p=0.5): identity in eval mode
    out_w = gslab_ref[G_OUTW:G_OUTW + H, :]                       # (H, 128); cols >= C zero
    logits = (jnp.dot(pooled, out_w, preferred_element_type=f32)
              + gslab_ref[G_VEC + 3:G_VEC + 4, :])                # (8, 128)
    out_ref[...] = logits.astype(out_ref.dtype)                   # single unmasked store


# ------------------------------ model (glue) ------------------------------- #
def _init_params(key):
    def nrm(key, shape, scale=0.02):
        return (scale * jax.random.normal(key, shape)).astype(DTYPE)

    keys = iter(jax.random.split(key, 64))
    p = {
        "word_emb": nrm(next(keys), (VOCAB, H)),
        "pos_emb": nrm(next(keys), (S, H)),
        "type_emb": nrm(next(keys), (N_TYPES, H)),
        "emb_ln_g": jnp.ones((1, H), DTYPE),
        "emb_ln_b": jnp.zeros((1, H), DTYPE),
        "pooler_w": nrm(next(keys), (H, H)),
        "pooler_b": jnp.zeros((1, H), DTYPE),
        "out_w": nrm(next(keys), (H, N_CLASSES)),
        "out_b": jnp.zeros((1, N_CLASSES), DTYPE),
        "layers": [],
    }
    for _ in range(N_LAYERS):
        lp = {
            "wq": nrm(next(keys), (H, H)), "bq": jnp.zeros((1, H), DTYPE),
            "wk": nrm(next(keys), (H, H)), "bk": jnp.zeros((1, H), DTYPE),
            "wv": nrm(next(keys), (H, H)), "bv": jnp.zeros((1, H), DTYPE),
            "wo": nrm(next(keys), (H, H)), "bo": jnp.zeros((1, H), DTYPE),
            "ln1_g": jnp.ones((1, H), DTYPE), "ln1_b": jnp.zeros((1, H), DTYPE),
            "w1": nrm(next(keys), (H, FF)), "b1": jnp.zeros((1, FF), DTYPE),
            "w2": nrm(next(keys), (FF, H)), "b2": jnp.zeros((1, H), DTYPE),
            "ln2_g": jnp.ones((1, H), DTYPE), "ln2_b": jnp.zeros((1, H), DTYPE),
        }
        p["layers"].append(lp)
    return p


def _build_fused_inputs(params, input_ids, attention_mask):
    """One-time host-side packing: 3 kernel inputs instead of 23 (cuts prologue DMAs)."""
    ids_col = input_ids.reshape(BS, 1).astype(jnp.int32)

    def pad2d(x, rows, cols):
        out = jnp.zeros((rows, cols), DTYPE)
        return out.at[:x.shape[0], :x.shape[1]].set(x.astype(DTYPE))

    # position + token_type(=0) embedding rows, laid out as (B*S, H)
    pos_type = jnp.tile(params["pos_emb"], (B, 1)) + params["type_emb"][0][None, :]

    # additive attention bias (BS, BS): block-diagonal per batch; padded keys -> -10000
    row_batch = jnp.arange(BS) // S
    same_batch = row_batch[:, None] == row_batch[None, :]
    key_keep = (attention_mask.reshape(BS) > 0)[None, :]
    bias = jnp.where(same_batch & key_keep, 0.0, NEG)

    # (8, BS) [CLS]-row selector; rows >= B stay zero so padded logits rows are benign
    cls_sel = jnp.zeros((OUT_ROWS, BS), DTYPE).at[
        jnp.arange(B), jnp.arange(B) * S].set(1.0)

    vec_block = jnp.zeros((8, OUT_COLS), DTYPE)
    vec_block = vec_block.at[0, :H].set(params["emb_ln_g"][0])
    vec_block = vec_block.at[1, :H].set(params["emb_ln_b"][0])
    vec_block = vec_block.at[2, :H].set(params["pooler_b"][0])
    vec_block = vec_block.at[3, :N_CLASSES].set(params["out_b"][0])

    gslab = jnp.concatenate([
        pad2d(pos_type, BS, OUT_COLS),                 # G_POS
        vec_block,                                     # G_VEC
        pad2d(bias, BS, OUT_COLS),                     # G_BIAS
        pad2d(cls_sel, OUT_ROWS, OUT_COLS),            # G_CLS
        pad2d(params["pooler_w"], H, OUT_COLS),        # G_POOLW
        pad2d(params["out_w"], H, OUT_COLS),           # G_OUTW
        pad2d(params["word_emb"], VPAD, OUT_COLS),     # G_EMB
    ], axis=0)
    assert gslab.shape == (G_ROWS, OUT_COLS)

    def layer_slab(lp):
        vec = jnp.zeros((8, 3 * H), DTYPE)
        vec = vec.at[0, :].set(jnp.concatenate([lp["bq"][0], lp["bk"][0], lp["bv"][0]]))
        vec = vec.at[1, :H].set(lp["bo"][0])
        vec = vec.at[2, :H].set(lp["ln1_g"][0])
        vec = vec.at[3, :H].set(lp["ln1_b"][0])
        vec = vec.at[4, :FF].set(lp["b1"][0])
        vec = vec.at[5, :H].set(lp["b2"][0])
        vec = vec.at[6, :H].set(lp["ln2_g"][0])
        vec = vec.at[7, :H].set(lp["ln2_b"][0])
        wqkv = jnp.concatenate([lp["wq"], lp["wk"], lp["wv"]], axis=1)   # (H, 3H)
        return jnp.concatenate([
            vec,                                   # L_VEC
            wqkv,                                  # L_WQKV
            pad2d(lp["wo"], H, 3 * H),             # L_WO
            pad2d(lp["w1"], H, 3 * H),             # L_W1
            pad2d(lp["w2"], FF, 3 * H),            # L_W2
        ], axis=0)

    lslab = jnp.stack([layer_slab(lp) for lp in params["layers"]])       # (L, 168, 3H)
    assert lslab.shape == (N_LAYERS, L_ROWS, 3 * H)

    return ids_col, gslab, lslab


def news_classifier_forward(params, input_ids, attention_mask):
    """Equivalent of NewsClassifier.forward(input_ids, attention_mask) in eval mode."""
    inputs = _build_fused_inputs(params, input_ids, attention_mask)
    in_specs = [_full_spec(x.shape) for x in inputs]
    # NOTE: for real-sized BERT on v6e/v7x, cast matmul operands to bf16 (keep f32
    # accumulation) and replace the in-kernel one-hot table with a scalar-prefetched
    # row gather; at this toy size everything stays f32 and VMEM-resident.
    out_pad = pl.pallas_call(
        _fused_forward_kernel,
        out_shape=jax.ShapeDtypeStruct((OUT_ROWS, OUT_COLS), DTYPE),
        grid=(1,),
        in_specs=in_specs,
        out_specs=_full_spec((OUT_ROWS, OUT_COLS)),
        compiler_params=pltpu.CompilerParams(
            dimension_semantics=("arbitrary",)),
    )(*inputs)
    return out_pad[:B, :N_CLASSES]


# --------------------------------- main ------------------------------------ #
if __name__ == "__main__":
    key = jax.random.PRNGKey(0)
    k_param, k_ids = jax.random.split(key)

    params = _init_params(k_param)

    input_ids = jax.random.randint(k_ids, (B, S), minval=0, maxval=VOCAB,
                                   dtype=jnp.int32)
    attention_mask = jnp.array(
        [[1, 1, 1, 1, 1, 1, 1, 1],
         [1, 1, 1, 1, 1, 0, 0, 0]], dtype=jnp.int32)

    logits = news_classifier_forward(params, input_ids, attention_mask)
    logits = jax.block_until_ready(logits)
    assert logits.shape == (B, N_CLASSES)
    assert bool(jnp.all(jnp.isfinite(logits)))
    print("KERNEL_OK")
</pallas_src>

<mosaic_0001>
module attributes {stable_mosaic.version = 11 : i64} {
  func.func @_fused_forward_kernel(%arg0: i32, %arg1: memref<16x1xi32, #tpu.memory_space<vmem>>, %arg2: memref<240x128xf32, #tpu.memory_space<vmem>>, %arg3: memref<2x168x96xf32, #tpu.memory_space<vmem>>, %arg4: memref<8x128xf32, #tpu.memory_space<vmem>>) attributes {dimension_semantics = [#tpu.dimension_semantics<arbitrary>], iteration_bounds = array<i64: 1>, scalar_prefetch = 0 : i64, scratch_operands = 0 : i64, tpu.core_type = #tpu.core_type<tc>, window_params = [{pipeline_mode = #tpu.pipeline_mode<synchronous>, transform_indices = @transform_0, window_bounds = array<i64: 16, 1>}, {pipeline_mode = #tpu.pipeline_mode<synchronous>, transform_indices = @transform_1, window_bounds = array<i64: 240, 128>}, {pipeline_mode = #tpu.pipeline_mode<synchronous>, transform_indices = @transform_2, window_bounds = array<i64: 2, 168, 96>}, {pipeline_mode = #tpu.pipeline_mode<synchronous>, transform_indices = @transform_3, window_bounds = array<i64: 8, 128>}]} {
    %c0 = arith.constant 0 : index
    %c0_0 = arith.constant 0 : index
    %0 = vector.load %arg1[%c0, %c0_0] : memref<16x1xi32, #tpu.memory_space<vmem>>, vector<16x1xi32>
    %1 = tpu.iota {dimensions = array<i32: 1>} : vector<16x128xi32>
    %2 = vector.broadcast %0 : vector<16x1xi32> to vector<16x128xi32>
    %3 = arith.cmpi eq, %1, %2 : vector<16x128xi32>
    %cst = arith.constant 1.000000e+00 : f32
    %cst_1 = arith.constant 0.000000e+00 : f32
    %4 = vector.broadcast %cst : f32 to vector<16x128xf32>
    %5 = vector.broadcast %cst_1 : f32 to vector<16x128xf32>
    %6 = arith.select %3, %4, %5 : vector<16x128xi1>, vector<16x128xf32>
    %c112 = arith.constant 112 : index
    %c0_2 = arith.constant 0 : index
    %7 = vector.load %arg2[%c112, %c0_2] : memref<240x128xf32, #tpu.memory_space<vmem>>, vector<128x32xf32>
    %cst_3 = arith.constant dense<0.000000e+00> : vector<16x32xf32>
    %8 = tpu.matmul %6, %7, %cst_3 {dimension_numbers = #tpu.dot_dimension_numbers<[1], [0], [0], [1], [0, 0, 1, 1], [], []>} : vector<16x128xf32>, vector<128x32xf32>, vector<16x32xf32> -> vector<16x32xf32>
    %c0_4 = arith.constant 0 : index
    %c0_5 = arith.constant 0 : index
    %9 = vector.load %arg2[%c0_4, %c0_5] : memref<240x128xf32, #tpu.memory_space<vmem>>, vector<16x32xf32>
    %10 = arith.addf %8, %9 : vector<16x32xf32>
    %c16 = arith.constant 16 : index
    %c0_6 = arith.constant 0 : index
    %11 = vector.load %arg2[%c16, %c0_6] : memref<240x128xf32, #tpu.memory_space<vmem>>, vector<1x32xf32>
    %c17 = arith.constant 17 : index
    %c0_7 = arith.constant 0 : index
    %12 = vector.load %arg2[%c17, %c0_7] : memref<240x128xf32, #tpu.memory_space<vmem>>, vector<1x32xf32>
    %cst_8 = arith.constant dense<0.000000e+00> : vector<16xf32>
    %13 = vector.multi_reduction <add>, %10, %cst_8 [1] : vector<16x32xf32> to vector<16xf32>
    %14 = vector.shape_cast %13 : vector<16xf32> to vector<16x1xf32>
    %cst_9 = arith.constant 3.200000e+01 : f32
    %15 = vector.broadcast %cst_9 : f32 to vector<16x1xf32>
    %16 = arith.divf %14, %15 : vector<16x1xf32>
    %17 = vector.broadcast %16 : vector<16x1xf32> to vector<16x32xf32>
    %18 = arith.subf %10, %17 : vector<16x32xf32>
    %19 = arith.mulf %18, %18 : vector<16x32xf32>
    %cst_10 = arith.constant dense<0.000000e+00> : vector<16xf32>
    %20 = vector.multi_reduction <add>, %19, %cst_10 [1] : vector<16x32xf32> to vector<16xf32>
    %21 = vector.shape_cast %20 : vector<16xf32> to vector<16x1xf32>
    %cst_11 = arith.constant 3.200000e+01 : f32
    %22 = vector.broadcast %cst_11 : f32 to vector<16x1xf32>
    %23 = arith.divf %21, %22 : vector<16x1xf32>
    %24 = vector.broadcast %16 : vector<16x1xf32> to vector<16x32xf32>
    %25 = arith.subf %10, %24 : vector<16x32xf32>
    %cst_12 = arith.constant 9.99999996E-13 : f32
    %26 = vector.broadcast %cst_12 : f32 to vector<16x1xf32>
    %27 = arith.addf %23, %26 : vector<16x1xf32>
    %28 = math.rsqrt %27 : vector<16x1xf32>
    %29 = vector.broadcast %28 : vector<16x1xf32> to vector<16x32xf32>
    %30 = arith.mulf %25, %29 : vector<16x32xf32>
    %31 = vector.broadcast %11 : vector<1x32xf32> to vector<16x32xf32>
    %32 = arith.mulf %30, %31 : vector<16x32xf32>
    %33 = vector.broadcast %12 : vector<1x32xf32> to vector<16x32xf32>
    %34 = arith.addf %32, %33 : vector<16x32xf32>
    %c24 = arith.constant 24 : index
    %c0_13 = arith.constant 0 : index
    %35 = vector.load %arg2[%c24, %c0_13] : memref<240x128xf32, #tpu.memory_space<vmem>>, vector<16x16xf32>
    %c0_14 = arith.constant 0 : index
    %c8 = arith.constant 8 : index
    %c0_15 = arith.constant 0 : index
    %36 = vector.load %arg3[%c0_14, %c8, %c0_15] : memref<2x168x96xf32, #tpu.memory_space<vmem>>, vector<1x32x96xf32>
    %37 = vector.shape_cast %36 : vector<1x32x96xf32> to vector<32x96xf32>
    %c0_16 = arith.constant 0 : index
    %c0_17 = arith.constant 0 : index
    %c0_18 = arith.constant 0 : index
    %38 = vector.load %arg3[%c0_16, %c0_17, %c0_18] : memref<2x168x96xf32, #tpu.memory_space<vmem>>, vector<1x1x96xf32>
    %39 = vector.shape_cast %38 : vector<1x1x96xf32> to vector<1x96xf32>
    %cst_19 = arith.constant dense<0.000000e+00> : vector<16x96xf32>
    %40 = tpu.matmul %34, %37, %cst_19 {dimension_numbers = #tpu.dot_dimension_numbers<[1], [0], [0], [1], [0, 0, 1, 1], [], []>} : vector<16x32xf32>, vector<32x96xf32>, vector<16x96xf32> -> vector<16x96xf32>
    %41 = vector.broadcast %39 : vector<1x96xf32> to vector<16x96xf32>
    %42 = arith.addf %40, %41 : vector<16x96xf32>
    %43 = vector.extract_strided_slice %42 {offsets = [0, 32], sizes = [16, 32], strides = [1, 1]} : vector<16x96xf32> to vector<16x32xf32>
    %44 = tpu.transpose %43, [1, 0] : vector<16x32xf32> -> vector<32x16xf32>
    %45 = vector.extract_strided_slice %42 {offsets = [0, 0], sizes = [16, 8], strides = [1, 1]} : vector<16x96xf32> to vector<16x8xf32>
    %46 = vector.extract_strided_slice %44 {offsets = [0, 0], sizes = [8, 16], strides = [1, 1]} : vector<32x16xf32> to vector<8x16xf32>
    %47 = vector.extract_strided_slice %42 {offsets = [0, 64], sizes = [16, 8], strides = [1, 1]} : vector<16x96xf32> to vector<16x8xf32>
    %cst_20 = arith.constant dense<0.000000e+00> : vector<16x16xf32>
    %48 = tpu.matmul %45, %46, %cst_20 {dimension_numbers = #tpu.dot_dimension_numbers<[1], [0], [0], [1], [0, 0, 1, 1], [], []>} : vector<16x8xf32>, vector<8x16xf32>, vector<16x16xf32> -> vector<16x16xf32>
    %cst_21 = arith.constant 0.353553385 : f32
    %49 = vector.broadcast %cst_21 : f32 to vector<16x16xf32>
    %50 = arith.mulf %48, %49 : vector<16x16xf32>
    %51 = arith.addf %50, %35 : vector<16x16xf32>
    %cst_22 = arith.constant dense<0xFF800000> : vector<16xf32>
    %52 = vector.multi_reduction <maximumf>, %51, %cst_22 [1] : vector<16x16xf32> to vector<16xf32>
    %53 = vector.shape_cast %52 : vector<16xf32> to vector<16x1xf32>
    %54 = vector.broadcast %53 : vector<16x1xf32> to vector<16x16xf32>
    %55 = arith.subf %51, %54 : vector<16x16xf32>
    %56 = math.exp %55 : vector<16x16xf32>
    %cst_23 = arith.constant dense<0.000000e+00> : vector<16xf32>
    %57 = vector.multi_reduction <add>, %56, %cst_23 [1] : vector<16x16xf32> to vector<16xf32>
    %58 = vector.shape_cast %57 : vector<16xf32> to vector<16x1xf32>
    %59 = tpu.reciprocal %58 {approx = true} : vector<16x1xf32> -> vector<16x1xf32>
    %60 = vector.broadcast %59 : vector<16x1xf32> to vector<16x16xf32>
    %61 = arith.mulf %56, %60 : vector<16x16xf32>
    %cst_24 = arith.constant dense<0.000000e+00> : vector<16x8xf32>
    %62 = tpu.matmul %61, %47, %cst_24 {dimension_numbers = #tpu.dot_dimension_numbers<[1], [0], [0], [1], [0, 0, 1, 1], [], []>} : vector<16x16xf32>, vector<16x8xf32>, vector<16x8xf32> -> vector<16x8xf32>
    %63 = vector.extract_strided_slice %42 {offsets = [0, 8], sizes = [16, 8], strides = [1, 1]} : vector<16x96xf32> to vector<16x8xf32>
    %64 = vector.extract_strided_slice %44 {offsets = [8, 0], sizes = [8, 16], strides = [1, 1]} : vector<32x16xf32> to vector<8x16xf32>
    %65 = vector.extract_strided_slice %42 {offsets = [0, 72], sizes = [16, 8], strides = [1, 1]} : vector<16x96xf32> to vector<16x8xf32>
    %cst_25 = arith.constant dense<0.000000e+00> : vector<16x16xf32>
    %66 = tpu.matmul %63, %64, %cst_25 {dimension_numbers = #tpu.dot_dimension_numbers<[1], [0], [0], [1], [0, 0, 1, 1], [], []>} : vector<16x8xf32>, vector<8x16xf32>, vector<16x16xf32> -> vector<16x16xf32>
    %cst_26 = arith.constant 0.353553385 : f32
    %67 = vector.broadcast %cst_26 : f32 to vector<16x16xf32>
    %68 = arith.mulf %66, %67 : vector<16x16xf32>
    %69 = arith.addf %68, %35 : vector<16x16xf32>
    %cst_27 = arith.constant dense<0xFF800000> : vector<16xf32>
    %70 = vector.multi_reduction <maximumf>, %69, %cst_27 [1] : vector<16x16xf32> to vector<16xf32>
    %71 = vector.shape_cast %70 : vector<16xf32> to vector<16x1xf32>
    %72 = vector.broadcast %71 : vector<16x1xf32> to vector<16x16xf32>
    %73 = arith.subf %69, %72 : vector<16x16xf32>
    %74 = math.exp %73 : vector<16x16xf32>
    %cst_28 = arith.constant dense<0.000000e+00> : vector<16xf32>
    %75 = vector.multi_reduction <add>, %74, %cst_28 [1] : vector<16x16xf32> to vector<16xf32>
    %76 = vector.shape_cast %75 : vector<16xf32> to vector<16x1xf32>
    %77 = tpu.reciprocal %76 {approx = true} : vector<16x1xf32> -> vector<16x1xf32>
    %78 = vector.broadcast %77 : vector<16x1xf32> to vector<16x16xf32>
    %79 = arith.mulf %74, %78 : vector<16x16xf32>
    %cst_29 = arith.constant dense<0.000000e+00> : vector<16x8xf32>
    %80 = tpu.matmul %79, %65, %cst_29 {dimension_numbers = #tpu.dot_dimension_numbers<[1], [0], [0], [1], [0, 0, 1, 1], [], []>} : vector<16x16xf32>, vector<16x8xf32>, vector<16x8xf32> -> vector<16x8xf32>
    %81 = vector.extract_strided_slice %42 {offsets = [0, 16], sizes = [16, 8], strides = [1, 1]} : vector<16x96xf32> to vector<16x8xf32>
    %82 = vector.extract_strided_slice %44 {offsets = [16, 0], sizes = [8, 16], strides = [1, 1]} : vector<32x16xf32> to vector<8x16xf32>
    %83 = vector.extract_strided_slice %42 {offsets = [0, 80], sizes = [16, 8], strides = [1, 1]} : vector<16x96xf32> to vector<16x8xf32>
    %cst_30 = arith.constant dense<0.000000e+00> : vector<16x16xf32>
    %84 = tpu.matmul %81, %82, %cst_30 {dimension_numbers = #tpu.dot_dimension_numbers<[1], [0], [0], [1], [0, 0, 1, 1], [], []>} : vector<16x8xf32>, vector<8x16xf32>, vector<16x16xf32> -> vector<16x16xf32>
    %cst_31 = arith.constant 0.353553385 : f32
    %85 = vector.broadcast %cst_31 : f32 to vector<16x16xf32>
    %86 = arith.mulf %84, %85 : vector<16x16xf32>
    %87 = arith.addf %86, %35 : vector<16x16xf32>
    %cst_32 = arith.constant dense<0xFF800000> : vector<16xf32>
    %88 = vector.multi_reduction <maximumf>, %87, %cst_32 [1] : vector<16x16xf32> to vector<16xf32>
    %89 = vector.shape_cast %88 : vector<16xf32> to vector<16x1xf32>
    %90 = vector.broadcast %89 : vector<16x1xf32> to vector<16x16xf32>
    %91 = arith.subf %87, %90 : vector<16x16xf32>
    %92 = math.exp %91 : vector<16x16xf32>
    %cst_33 = arith.constant dense<0.000000e+00> : vector<16xf32>
    %93 = vector.multi_reduction <add>, %92, %cst_33 [1] : vector<16x16xf32> to vector<16xf32>
    %94 = vector.shape_cast %93 : vector<16xf32> to vector<16x1xf32>
    %95 = tpu.reciprocal %94 {approx = true} : vector<16x1xf32> -> vector<16x1xf32>
    %96 = vector.broadcast %95 : vector<16x1xf32> to vector<16x16xf32>
    %97 = arith.mulf %92, %96 : vector<16x16xf32>
    %cst_34 = arith.constant dense<0.000000e+00> : vector<16x8xf32>
    %98 = tpu.matmul %97, %83, %cst_34 {dimension_numbers = #tpu.dot_dimension_numbers<[1], [0], [0], [1], [0, 0, 1, 1], [], []>} : vector<16x16xf32>, vector<16x8xf32>, vector<16x8xf32> -> vector<16x8xf32>
    %99 = vector.extract_strided_slice %42 {offsets = [0, 24], sizes = [16, 8], strides = [1, 1]} : vector<16x96xf32> to vector<16x8xf32>
    %100 = vector.extract_strided_slice %44 {offsets = [24, 0], sizes = [8, 16], strides = [1, 1]} : vector<32x16xf32> to vector<8x16xf32>
    %101 = vector.extract_strided_slice %42 {offsets = [0, 88], sizes = [16, 8], strides = [1, 1]} : vector<16x96xf32> to vector<16x8xf32>
    %cst_35 = arith.constant dense<0.000000e+00> : vector<16x16xf32>
    %102 = tpu.matmul %99, %100, %cst_35 {dimension_numbers = #tpu.dot_dimension_numbers<[1], [0], [0], [1], [0, 0, 1, 1], [], []>} : vector<16x8xf32>, vector<8x16xf32>, vector<16x16xf32> -> vector<16x16xf32>
    %cst_36 = arith.constant 0.353553385 : f32
    %103 = vector.broadcast %cst_36 : f32 to vector<16x16xf32>
    %104 = arith.mulf %102, %103 : vector<16x16xf32>
    %105 = arith.addf %104, %35 : vector<16x16xf32>
    %cst_37 = arith.constant dense<0xFF800000> : vector<16xf32>
    %106 = vector.multi_reduction <maximumf>, %105, %cst_37 [1] : vector<16x16xf32> to vector<16xf32>
    %107 = vector.shape_cast %106 : vector<16xf32> to vector<16x1xf32>
    %108 = vector.broadcast %107 : vector<16x1xf32> to vector<16x16xf32>
    %109 = arith.subf %105, %108 : vector<16x16xf32>
    %110 = math.exp %109 : vector<16x16xf32>
    %cst_38 = arith.constant dense<0.000000e+00> : vector<16xf32>
    %111 = vector.multi_reduction <add>, %110, %cst_38 [1] : vector<16x16xf32> to vector<16xf32>
    %112 = vector.shape_cast %111 : vector<16xf32> to vector<16x1xf32>
    %113 = tpu.reciprocal %112 {approx = true} : vector<16x1xf32> -> vector<16x1xf32>
    %114 = vector.broadcast %113 : vector<16x1xf32> to vector<16x16xf32>
    %115 = arith.mulf %110, %114 : vector<16x16xf32>
    %cst_39 = arith.constant dense<0.000000e+00> : vector<16x8xf32>
    %116 = tpu.matmul %115, %101, %cst_39 {dimension_numbers = #tpu.dot_dimension_numbers<[1], [0], [0], [1], [0, 0, 1, 1], [], []>} : vector<16x16xf32>, vector<16x8xf32>, vector<16x8xf32> -> vector<16x8xf32>
    %117 = tpu.concatenate %62, %80, %98, %116 in 1 : vector<16x8xf32>, vector<16x8xf32>, vector<16x8xf32>, vector<16x8xf32> -> vector<16x32xf32>
    %c0_40 = arith.constant 0 : index
    %c40 = arith.constant 40 : index
    %c0_41 = arith.constant 0 : index
    %118 = vector.load %arg3[%c0_40, %c40, %c0_41] : memref<2x168x96xf32, #tpu.memory_space<vmem>>, vector<1x32x32xf32>
    %119 = vector.shape_cast %118 : vector<1x32x32xf32> to vector<32x32xf32>
    %cst_42 = arith.constant dense<0.000000e+00> : vector<16x32xf32>
    %120 = tpu.matmul %117, %119, %cst_42 {dimension_numbers = #tpu.dot_dimension_numbers<[1], [0], [0], [1], [0, 0, 1, 1], [], []>} : vector<16x32xf32>, vector<32x32xf32>, vector<16x32xf32> -> vector<16x32xf32>
    %c0_43 = arith.constant 0 : index
    %c1 = arith.constant 1 : index
    %c0_44 = arith.constant 0 : index
    %121 = vector.load %arg3[%c0_43, %c1, %c0_44] : memref<2x168x96xf32, #tpu.memory_space<vmem>>, vector<1x1x32xf32>
    %122 = vector.shape_cast %121 : vector<1x1x32xf32> to vector<1x32xf32>
    %123 = vector.broadcast %122 : vector<1x32xf32> to vector<16x32xf32>
    %124 = arith.addf %120, %123 : vector<16x32xf32>
    %125 = arith.addf %34, %124 : vector<16x32xf32>
    %c0_45 = arith.constant 0 : index
    %c2 = arith.constant 2 : index
    %c0_46 = arith.constant 0 : index
    %126 = vector.load %arg3[%c0_45, %c2, %c0_46] : memref<2x168x96xf32, #tpu.memory_space<vmem>>, vector<1x1x32xf32>
    %127 = vector.shape_cast %126 : vector<1x1x32xf32> to vector<1x32xf32>
    %c0_47 = arith.constant 0 : index
    %c3 = arith.constant 3 : index
    %c0_48 = arith.constant 0 : index
    %128 = vector.load %arg3[%c0_47, %c3, %c0_48] : memref<2x168x96xf32, #tpu.memory_space<vmem>>, vector<1x1x32xf32>
    %129 = vector.shape_cast %128 : vector<1x1x32xf32> to vector<1x32xf32>
    %cst_49 = arith.constant dense<0.000000e+00> : vector<16xf32>
    %130 = vector.multi_reduction <add>, %125, %cst_49 [1] : vector<16x32xf32> to vector<16xf32>
    %131 = vector.shape_cast %130 : vector<16xf32> to vector<16x1xf32>
    %cst_50 = arith.constant 3.200000e+01 : f32
    %132 = vector.broadcast %cst_50 : f32 to vector<16x1xf32>
    %133 = arith.divf %131, %132 : vector<16x1xf32>
    %134 = vector.broadcast %133 : vector<16x1xf32> to vector<16x32xf32>
    %135 = arith.subf %125, %134 : vector<16x32xf32>
    %136 = arith.mulf %135, %135 : vector<16x32xf32>
    %cst_51 = arith.constant dense<0.000000e+00> : vector<16xf32>
    %137 = vector.multi_reduction <add>, %136, %cst_51 [1] : vector<16x32xf32> to vector<16xf32>
    %138 = vector.shape_cast %137 : vector<16xf32> to vector<16x1xf32>
    %cst_52 = arith.constant 3.200000e+01 : f32
    %139 = vector.broadcast %cst_52 : f32 to vector<16x1xf32>
    %140 = arith.divf %138, %139 : vector<16x1xf32>
    %141 = vector.broadcast %133 : vector<16x1xf32> to vector<16x32xf32>
    %142 = arith.subf %125, %141 : vector<16x32xf32>
    %cst_53 = arith.constant 9.99999996E-13 : f32
    %143 = vector.broadcast %cst_53 : f32 to vector<16x1xf32>
    %144 = arith.addf %140, %143 : vector<16x1xf32>
    %145 = math.rsqrt %144 : vector<16x1xf32>
    %146 = vector.broadcast %145 : vector<16x1xf32> to vector<16x32xf32>
    %147 = arith.mulf %142, %146 : vector<16x32xf32>
    %148 = vector.broadcast %127 : vector<1x32xf32> to vector<16x32xf32>
    %149 = arith.mulf %147, %148 : vector<16x32xf32>
    %150 = vector.broadcast %129 : vector<1x32xf32> to vector<16x32xf32>
    %151 = arith.addf %149, %150 : vector<16x32xf32>
    %c0_54 = arith.constant 0 : index
    %c72 = arith.constant 72 : index
    %c0_55 = arith.constant 0 : index
    %152 = vector.load %arg3[%c0_54, %c72, %c0_55] : memref<2x168x96xf32, #tpu.memory_space<vmem>>, vector<1x32x64xf32>
    %153 = vector.shape_cast %152 : vector<1x32x64xf32> to vector<32x64xf32>
    %cst_56 = arith.constant dense<0.000000e+00> : vector<16x64xf32>
    %154 = tpu.matmul %151, %153, %cst_56 {dimension_numbers = #tpu.dot_dimension_numbers<[1], [0], [0], [1], [0, 0, 1, 1], [], []>} : vector<16x32xf32>, vector<32x64xf32>, vector<16x64xf32> -> vector<16x64xf32>
    %c0_57 = arith.constant 0 : index
    %c4 = arith.constant 4 : index
    %c0_58 = arith.constant 0 : index
    %155 = vector.load %arg3[%c0_57, %c4, %c0_58] : memref<2x168x96xf32, #tpu.memory_space<vmem>>, vector<1x1x64xf32>
    %156 = vector.shape_cast %155 : vector<1x1x64xf32> to vector<1x64xf32>
    %157 = vector.broadcast %156 : vector<1x64xf32> to vector<16x64xf32>
    %158 = arith.addf %154, %157 : vector<16x64xf32>
    %cst_59 = arith.constant 5.000000e-01 : f32
    %159 = vector.broadcast %cst_59 : f32 to vector<16x64xf32>
    %160 = arith.mulf %159, %158 : vector<16x64xf32>
    %cst_60 = arith.constant 4.471500e-02 : f32
    %161 = vector.broadcast %cst_60 : f32 to vector<16x64xf32>
    %162 = arith.mulf %161, %158 : vector<16x64xf32>
    %163 = arith.mulf %162, %158 : vector<16x64xf32>
    %164 = arith.mulf %163, %158 : vector<16x64xf32>
    %165 = arith.addf %158, %164 : vector<16x64xf32>
    %cst_61 = arith.constant 0.797884583 : f32
    %166 = vector.broadcast %cst_61 : f32 to vector<16x64xf32>
    %167 = arith.mulf %166, %165 : vector<16x64xf32>
    %168 = math.tanh %167 : vector<16x64xf32>
    %cst_62 = arith.constant 1.000000e+00 : f32
    %169 = vector.broadcast %cst_62 : f32 to vector<16x64xf32>
    %170 = arith.addf %169, %168 : vector<16x64xf32>
    %171 = arith.mulf %160, %170 : vector<16x64xf32>
    %c0_63 = arith.constant 0 : index
    %c104 = arith.constant 104 : index
    %c0_64 = arith.constant 0 : index
    %172 = vector.load %arg3[%c0_63, %c104, %c0_64] : memref<2x168x96xf32, #tpu.memory_space<vmem>>, vector<1x64x32xf32>
    %173 = vector.shape_cast %172 : vector<1x64x32xf32> to vector<64x32xf32>
    %cst_65 = arith.constant dense<0.000000e+00> : vector<16x32xf32>
    %174 = tpu.matmul %171, %173, %cst_65 {dimension_numbers = #tpu.dot_dimension_numbers<[1], [0], [0], [1], [0, 0, 1, 1], [], []>} : vector<16x64xf32>, vector<64x32xf32>, vector<16x32xf32> -> vector<16x32xf32>
    %c0_66 = arith.constant 0 : index
    %c5 = arith.constant 5 : index
    %c0_67 = arith.constant 0 : index
    %175 = vector.load %arg3[%c0_66, %c5, %c0_67] : memref<2x168x96xf32, #tpu.memory_space<vmem>>, vector<1x1x32xf32>
    %176 = vector.shape_cast %175 : vector<1x1x32xf32> to vector<1x32xf32>
    %177 = vector.broadcast %176 : vector<1x32xf32> to vector<16x32xf32>
    %178 = arith.addf %174, %177 : vector<16x32xf32>
    %179 = arith.addf %151, %178 : vector<16x32xf32>
    %c0_68 = arith.constant 0 : index
    %c6 = arith.constant 6 : index
    %c0_69 = arith.constant 0 : index
    %180 = vector.load %arg3[%c0_68, %c6, %c0_69] : memref<2x168x96xf32, #tpu.memory_space<vmem>>, vector<1x1x32xf32>
    %181 = vector.shape_cast %180 : vector<1x1x32xf32> to vector<1x32xf32>
    %c0_70 = arith.constant 0 : index
    %c7 = arith.constant 7 : index
    %c0_71 = arith.constant 0 : index
    %182 = vector.load %arg3[%c0_70, %c7, %c0_71] : memref<2x168x96xf32, #tpu.memory_space<vmem>>, vector<1x1x32xf32>
    %183 = vector.shape_cast %182 : vector<1x1x32xf32> to vector<1x32xf32>
    %cst_72 = arith.constant dense<0.000000e+00> : vector<16xf32>
    %184 = vector.multi_reduction <add>, %179, %cst_72 [1] : vector<16x32xf32> to vector<16xf32>
    %185 = vector.shape_cast %184 : vector<16xf32> to vector<16x1xf32>
    %cst_73 = arith.constant 3.200000e+01 : f32
    %186 = vector.broadcast %cst_73 : f32 to vector<16x1xf32>
    %187 = arith.divf %185, %186 : vector<16x1xf32>
    %188 = vector.broadcast %187 : vector<16x1xf32> to vector<16x32xf32>
    %189 = arith.subf %179, %188 : vector<16x32xf32>
    %190 = arith.mulf %189, %189 : vector<16x32xf32>
    %cst_74 = arith.constant dense<0.000000e+00> : vector<16xf32>
    %191 = vector.multi_reduction <add>, %190, %cst_74 [1] : vector<16x32xf32> to vector<16xf32>
    %192 = vector.shape_cast %191 : vector<16xf32> to vector<16x1xf32>
    %cst_75 = arith.constant 3.200000e+01 : f32
    %193 = vector.broadcast %cst_75 : f32 to vector<16x1xf32>
    %194 = arith.divf %192, %193 : vector<16x1xf32>
    %195 = vector.broadcast %187 : vector<16x1xf32> to vector<16x32xf32>
    %196 = arith.subf %179, %195 : vector<16x32xf32>
    %cst_76 = arith.constant 9.99999996E-13 : f32
    %197 = vector.broadcast %cst_76 : f32 to vector<16x1xf32>
    %198 = arith.addf %194, %197 : vector<16x1xf32>
    %199 = math.rsqrt %198 : vector<16x1xf32>
    %200 = vector.broadcast %199 : vector<16x1xf32> to vector<16x32xf32>
    %201 = arith.mulf %196, %200 : vector<16x32xf32>
    %202 = vector.broadcast %181 : vector<1x32xf32> to vector<16x32xf32>
    %203 = arith.mulf %201, %202 : vector<16x32xf32>
    %204 = vector.broadcast %183 : vector<1x32xf32> to vector<16x32xf32>
    %205 = arith.addf %203, %204 : vector<16x32xf32>
    %c1_77 = arith.constant 1 : index
    %c8_78 = arith.constant 8 : index
    %c0_79 = arith.constant 0 : index
    %206 = vector.load %arg3[%c1_77, %c8_78, %c0_79] : memref<2x168x96xf32, #tpu.memory_space<vmem>>, vector<1x32x96xf32>
    %207 = vector.shape_cast %206 : vector<1x32x96xf32> to vector<32x96xf32>
    %c1_80 = arith.constant 1 : index
    %c0_81 = arith.constant 0 : index
    %c0_82 = arith.constant 0 : index
    %208 = vector.load %arg3[%c1_80, %c0_81, %c0_82] : memref<2x168x96xf32, #tpu.memory_space<vmem>>, vector<1x1x96xf32>
    %209 = vector.shape_cast %208 : vector<1x1x96xf32> to vector<1x96xf32>
    %cst_83 = arith.constant dense<0.000000e+00> : vector<16x96xf32>
    %210 = tpu.matmul %205, %207, %cst_83 {dimension_numbers = #tpu.dot_dimension_numbers<[1], [0], [0], [1], [0, 0, 1, 1], [], []>} : vector<16x32xf32>, vector<32x96xf32>, vector<16x96xf32> -> vector<16x96xf32>
    %211 = vector.broadcast %209 : vector<1x96xf32> to vector<16x96xf32>
    %212 = arith.addf %210, %211 : vector<16x96xf32>
    %213 = vector.extract_strided_slice %212 {offsets = [0, 32], sizes = [16, 32], strides = [1, 1]} : vector<16x96xf32> to vector<16x32xf32>
    %214 = tpu.transpose %213, [1, 0] : vector<16x32xf32> -> vector<32x16xf32>
    %215 = vector.extract_strided_slice %212 {offsets = [0, 0], sizes = [16, 8], strides = [1, 1]} : vector<16x96xf32> to vector<16x8xf32>
    %216 = vector.extract_strided_slice %214 {offsets = [0, 0], sizes = [8, 16], strides = [1, 1]} : vector<32x16xf32> to vector<8x16xf32>
    %217 = vector.extract_strided_slice %212 {offsets = [0, 64], sizes = [16, 8], strides = [1, 1]} : vector<16x96xf32> to vector<16x8xf32>
    %cst_84 = arith.constant dense<0.000000e+00> : vector<16x16xf32>
    %218 = tpu.matmul %215, %216, %cst_84 {dimension_numbers = #tpu.dot_dimension_numbers<[1], [0], [0], [1], [0, 0, 1, 1], [], []>} : vector<16x8xf32>, vector<8x16xf32>, vector<16x16xf32> -> vector<16x16xf32>
    %cst_85 = arith.constant 0.353553385 : f32
    %219 = vector.broadcast %cst_85 : f32 to vector<16x16xf32>
    %220 = arith.mulf %218, %219 : vector<16x16xf32>
    %221 = arith.addf %220, %35 : vector<16x16xf32>
    %cst_86 = arith.constant dense<0xFF800000> : vector<16xf32>
    %222 = vector.multi_reduction <maximumf>, %221, %cst_86 [1] : vector<16x16xf32> to vector<16xf32>
    %223 = vector.shape_cast %222 : vector<16xf32> to vector<16x1xf32>
    %224 = vector.broadcast %223 : vector<16x1xf32> to vector<16x16xf32>
    %225 = arith.subf %221, %224 : vector<16x16xf32>
    %226 = math.exp %225 : vector<16x16xf32>
    %cst_87 = arith.constant dense<0.000000e+00> : vector<16xf32>
    %227 = vector.multi_reduction <add>, %226, %cst_87 [1] : vector<16x16xf32> to vector<16xf32>
    %228 = vector.shape_cast %227 : vector<16xf32> to vector<16x1xf32>
    %229 = tpu.reciprocal %228 {approx = true} : vector<16x1xf32> -> vector<16x1xf32>
    %230 = vector.broadcast %229 : vector<16x1xf32> to vector<16x16xf32>
    %231 = arith.mulf %226, %230 : vector<16x16xf32>
    %cst_88 = arith.constant dense<0.000000e+00> : vector<16x8xf32>
    %232 = tpu.matmul %231, %217, %cst_88 {dimension_numbers = #tpu.dot_dimension_numbers<[1], [0], [0], [1], [0, 0, 1, 1], [], []>} : vector<16x16xf32>, vector<16x8xf32>, vector<16x8xf32> -> vector<16x8xf32>
    %233 = vector.extract_strided_slice %212 {offsets = [0, 8], sizes = [16, 8], strides = [1, 1]} : vector<16x96xf32> to vector<16x8xf32>
    %234 = vector.extract_strided_slice %214 {offsets = [8, 0], sizes = [8, 16], strides = [1, 1]} : vector<32x16xf32> to vector<8x16xf32>
    %235 = vector.extract_strided_slice %212 {offsets = [0, 72], sizes = [16, 8], strides = [1, 1]} : vector<16x96xf32> to vector<16x8xf32>
    %cst_89 = arith.constant dense<0.000000e+00> : vector<16x16xf32>
    %236 = tpu.matmul %233, %234, %cst_89 {dimension_numbers = #tpu.dot_dimension_numbers<[1], [0], [0], [1], [0, 0, 1, 1], [], []>} : vector<16x8xf32>, vector<8x16xf32>, vector<16x16xf32> -> vector<16x16xf32>
    %cst_90 = arith.constant 0.353553385 : f32
    %237 = vector.broadcast %cst_90 : f32 to vector<16x16xf32>
    %238 = arith.mulf %236, %237 : vector<16x16xf32>
    %239 = arith.addf %238, %35 : vector<16x16xf32>
    %cst_91 = arith.constant dense<0xFF800000> : vector<16xf32>
    %240 = vector.multi_reduction <maximumf>, %239, %cst_91 [1] : vector<16x16xf32> to vector<16xf32>
    %241 = vector.shape_cast %240 : vector<16xf32> to vector<16x1xf32>
    %242 = vector.broadcast %241 : vector<16x1xf32> to vector<16x16xf32>
    %243 = arith.subf %239, %242 : vector<16x16xf32>
    %244 = math.exp %243 : vector<16x16xf32>
    %cst_92 = arith.constant dense<0.000000e+00> : vector<16xf32>
    %245 = vector.multi_reduction <add>, %244, %cst_92 [1] : vector<16x16xf32> to vector<16xf32>
    %246 = vector.shape_cast %245 : vector<16xf32> to vector<16x1xf32>
    %247 = tpu.reciprocal %246 {approx = true} : vector<16x1xf32> -> vector<16x1xf32>
    %248 = vector.broadcast %247 : vector<16x1xf32> to vector<16x16xf32>
    %249 = arith.mulf %244, %248 : vector<16x16xf32>
    %cst_93 = arith.constant dense<0.000000e+00> : vector<16x8xf32>
    %250 = tpu.matmul %249, %235, %cst_93 {dimension_numbers = #tpu.dot_dimension_numbers<[1], [0], [0], [1], [0, 0, 1, 1], [], []>} : vector<16x16xf32>, vector<16x8xf32>, vector<16x8xf32> -> vector<16x8xf32>
    %251 = vector.extract_strided_slice %212 {offsets = [0, 16], sizes = [16, 8], strides = [1, 1]} : vector<16x96xf32> to vector<16x8xf32>
    %252 = vector.extract_strided_slice %214 {offsets = [16, 0], sizes = [8, 16], strides = [1, 1]} : vector<32x16xf32> to vector<8x16xf32>
    %253 = vector.extract_strided_slice %212 {offsets = [0, 80], sizes = [16, 8], strides = [1, 1]} : vector<16x96xf32> to vector<16x8xf32>
    %cst_94 = arith.constant dense<0.000000e+00> : vector<16x16xf32>
    %254 = tpu.matmul %251, %252, %cst_94 {dimension_numbers = #tpu.dot_dimension_numbers<[1], [0], [0], [1], [0, 0, 1, 1], [], []>} : vector<16x8xf32>, vector<8x16xf32>, vector<16x16xf32> -> vector<16x16xf32>
    %cst_95 = arith.constant 0.353553385 : f32
    %255 = vector.broadcast %cst_95 : f32 to vector<16x16xf32>
    %256 = arith.mulf %254, %255 : vector<16x16xf32>
    %257 = arith.addf %256, %35 : vector<16x16xf32>
    %cst_96 = arith.constant dense<0xFF800000> : vector<16xf32>
    %258 = vector.multi_reduction <maximumf>, %257, %cst_96 [1] : vector<16x16xf32> to vector<16xf32>
    %259 = vector.shape_cast %258 : vector<16xf32> to vector<16x1xf32>
    %260 = vector.broadcast %259 : vector<16x1xf32> to vector<16x16xf32>
    %261 = arith.subf %257, %260 : vector<16x16xf32>
    %262 = math.exp %261 : vector<16x16xf32>
    %cst_97 = arith.constant dense<0.000000e+00> : vector<16xf32>
    %263 = vector.multi_reduction <add>, %262, %cst_97 [1] : vector<16x16xf32> to vector<16xf32>
    %264 = vector.shape_cast %263 : vector<16xf32> to vector<16x1xf32>
    %265 = tpu.reciprocal %264 {approx = true} : vector<16x1xf32> -> vector<16x1xf32>
    %266 = vector.broadcast %265 : vector<16x1xf32> to vector<16x16xf32>
    %267 = arith.mulf %262, %266 : vector<16x16xf32>
    %cst_98 = arith.constant dense<0.000000e+00> : vector<16x8xf32>
    %268 = tpu.matmul %267, %253, %cst_98 {dimension_numbers = #tpu.dot_dimension_numbers<[1], [0], [0], [1], [0, 0, 1, 1], [], []>} : vector<16x16xf32>, vector<16x8xf32>, vector<16x8xf32> -> vector<16x8xf32>
    %269 = vector.extract_strided_slice %212 {offsets = [0, 24], sizes = [16, 8], strides = [1, 1]} : vector<16x96xf32> to vector<16x8xf32>
    %270 = vector.extract_strided_slice %214 {offsets = [24, 0], sizes = [8, 16], strides = [1, 1]} : vector<32x16xf32> to vector<8x16xf32>
    %271 = vector.extract_strided_slice %212 {offsets = [0, 88], sizes = [16, 8], strides = [1, 1]} : vector<16x96xf32> to vector<16x8xf32>
    %cst_99 = arith.constant dense<0.000000e+00> : vector<16x16xf32>
    %272 = tpu.matmul %269, %270, %cst_99 {dimension_numbers = #tpu.dot_dimension_numbers<[1], [0], [0], [1], [0, 0, 1, 1], [], []>} : vector<16x8xf32>, vector<8x16xf32>, vector<16x16xf32> -> vector<16x16xf32>
    %cst_100 = arith.constant 0.353553385 : f32
    %273 = vector.broadcast %cst_100 : f32 to vector<16x16xf32>
    %274 = arith.mulf %272, %273 : vector<16x16xf32>
    %275 = arith.addf %274, %35 : vector<16x16xf32>
    %cst_101 = arith.constant dense<0xFF800000> : vector<16xf32>
    %276 = vector.multi_reduction <maximumf>, %275, %cst_101 [1] : vector<16x16xf32> to vector<16xf32>
    %277 = vector.shape_cast %276 : vector<16xf32> to vector<16x1xf32>
    %278 = vector.broadcast %277 : vector<16x1xf32> to vector<16x16xf32>
    %279 = arith.subf %275, %278 : vector<16x16xf32>
    %280 = math.exp %279 : vector<16x16xf32>
    %cst_102 = arith.constant dense<0.000000e+00> : vector<16xf32>
    %281 = vector.multi_reduction <add>, %280, %cst_102 [1] : vector<16x16xf32> to vector<16xf32>
    %282 = vector.shape_cast %281 : vector<16xf32> to vector<16x1xf32>
    %283 = tpu.reciprocal %282 {approx = true} : vector<16x1xf32> -> vector<16x1xf32>
    %284 = vector.broadcast %283 : vector<16x1xf32> to vector<16x16xf32>
    %285 = arith.mulf %280, %284 : vector<16x16xf32>
    %cst_103 = arith.constant dense<0.000000e+00> : vector<16x8xf32>
    %286 = tpu.matmul %285, %271, %cst_103 {dimension_numbers = #tpu.dot_dimension_numbers<[1], [0], [0], [1], [0, 0, 1, 1], [], []>} : vector<16x16xf32>, vector<16x8xf32>, vector<16x8xf32> -> vector<16x8xf32>
    %287 = tpu.concatenate %232, %250, %268, %286 in 1 : vector<16x8xf32>, vector<16x8xf32>, vector<16x8xf32>, vector<16x8xf32> -> vector<16x32xf32>
    %c1_104 = arith.constant 1 : index
    %c40_105 = arith.constant 40 : index
    %c0_106 = arith.constant 0 : index
    %288 = vector.load %arg3[%c1_104, %c40_105, %c0_106] : memref<2x168x96xf32, #tpu.memory_space<vmem>>, vector<1x32x32xf32>
    %289 = vector.shape_cast %288 : vector<1x32x32xf32> to vector<32x32xf32>
    %cst_107 = arith.constant dense<0.000000e+00> : vector<16x32xf32>
    %290 = tpu.matmul %287, %289, %cst_107 {dimension_numbers = #tpu.dot_dimension_numbers<[1], [0], [0], [1], [0, 0, 1, 1], [], []>} : vector<16x32xf32>, vector<32x32xf32>, vector<16x32xf32> -> vector<16x32xf32>
    %c1_108 = arith.constant 1 : index
    %c1_109 = arith.constant 1 : index
    %c0_110 = arith.constant 0 : index
    %291 = vector.load %arg3[%c1_108, %c1_109, %c0_110] : memref<2x168x96xf32, #tpu.memory_space<vmem>>, vector<1x1x32xf32>
    %292 = vector.shape_cast %291 : vector<1x1x32xf32> to vector<1x32xf32>
    %293 = vector.broadcast %292 : vector<1x32xf32> to vector<16x32xf32>
    %294 = arith.addf %290, %293 : vector<16x32xf32>
    %295 = arith.addf %205, %294 : vector<16x32xf32>
    %c1_111 = arith.constant 1 : index
    %c2_112 = arith.constant 2 : index
    %c0_113 = arith.constant 0 : index
    %296 = vector.load %arg3[%c1_111, %c2_112, %c0_113] : memref<2x168x96xf32, #tpu.memory_space<vmem>>, vector<1x1x32xf32>
    %297 = vector.shape_cast %296 : vector<1x1x32xf32> to vector<1x32xf32>
    %c1_114 = arith.constant 1 : index
    %c3_115 = arith.constant 3 : index
    %c0_116 = arith.constant 0 : index
    %298 = vector.load %arg3[%c1_114, %c3_115, %c0_116] : memref<2x168x96xf32, #tpu.memory_space<vmem>>, vector<1x1x32xf32>
    %299 = vector.shape_cast %298 : vector<1x1x32xf32> to vector<1x32xf32>
    %cst_117 = arith.constant dense<0.000000e+00> : vector<16xf32>
    %300 = vector.multi_reduction <add>, %295, %cst_117 [1] : vector<16x32xf32> to vector<16xf32>
    %301 = vector.shape_cast %300 : vector<16xf32> to vector<16x1xf32>
    %cst_118 = arith.constant 3.200000e+01 : f32
    %302 = vector.broadcast %cst_118 : f32 to vector<16x1xf32>
    %303 = arith.divf %301, %302 : vector<16x1xf32>
    %304 = vector.broadcast %303 : vector<16x1xf32> to vector<16x32xf32>
    %305 = arith.subf %295, %304 : vector<16x32xf32>
    %306 = arith.mulf %305, %305 : vector<16x32xf32>
    %cst_119 = arith.constant dense<0.000000e+00> : vector<16xf32>
    %307 = vector.multi_reduction <add>, %306, %cst_119 [1] : vector<16x32xf32> to vector<16xf32>
    %308 = vector.shape_cast %307 : vector<16xf32> to vector<16x1xf32>
    %cst_120 = arith.constant 3.200000e+01 : f32
    %309 = vector.broadcast %cst_120 : f32 to vector<16x1xf32>
    %310 = arith.divf %308, %309 : vector<16x1xf32>
    %311 = vector.broadcast %303 : vector<16x1xf32> to vector<16x32xf32>
    %312 = arith.subf %295, %311 : vector<16x32xf32>
    %cst_121 = arith.constant 9.99999996E-13 : f32
    %313 = vector.broadcast %cst_121 : f32 to vector<16x1xf32>
    %314 = arith.addf %310, %313 : vector<16x1xf32>
    %315 = math.rsqrt %314 : vector<16x1xf32>
    %316 = vector.broadcast %315 : vector<16x1xf32> to vector<16x32xf32>
    %317 = arith.mulf %312, %316 : vector<16x32xf32>
    %318 = vector.broadcast %297 : vector<1x32xf32> to vector<16x32xf32>
    %319 = arith.mulf %317, %318 : vector<16x32xf32>
    %320 = vector.broadcast %299 : vector<1x32xf32> to vector<16x32xf32>
    %321 = arith.addf %319, %320 : vector<16x32xf32>
    %c1_122 = arith.constant 1 : index
    %c72_123 = arith.constant 72 : index
    %c0_124 = arith.constant 0 : index
    %322 = vector.load %arg3[%c1_122, %c72_123, %c0_124] : memref<2x168x96xf32, #tpu.memory_space<vmem>>, vector<1x32x64xf32>
    %323 = vector.shape_cast %322 : vector<1x32x64xf32> to vector<32x64xf32>
    %cst_125 = arith.constant dense<0.000000e+00> : vector<16x64xf32>
    %324 = tpu.matmul %321, %323, %cst_125 {dimension_numbers = #tpu.dot_dimension_numbers<[1], [0], [0], [1], [0, 0, 1, 1], [], []>} : vector<16x32xf32>, vector<32x64xf32>, vector<16x64xf32> -> vector<16x64xf32>
    %c1_126 = arith.constant 1 : index
    %c4_127 = arith.constant 4 : index
    %c0_128 = arith.constant 0 : index
    %325 = vector.load %arg3[%c1_126, %c4_127, %c0_128] : memref<2x168x96xf32, #tpu.memory_space<vmem>>, vector<1x1x64xf32>
    %326 = vector.shape_cast %325 : vector<1x1x64xf32> to vector<1x64xf32>
    %327 = vector.broadcast %326 : vector<1x64xf32> to vector<16x64xf32>
    %328 = arith.addf %324, %327 : vector<16x64xf32>
    %cst_129 = arith.constant 5.000000e-01 : f32
    %329 = vector.broadcast %cst_129 : f32 to vector<16x64xf32>
    %330 = arith.mulf %329, %328 : vector<16x64xf32>
    %cst_130 = arith.constant 4.471500e-02 : f32
    %331 = vector.broadcast %cst_130 : f32 to vector<16x64xf32>
    %332 = arith.mulf %331, %328 : vector<16x64xf32>
    %333 = arith.mulf %332, %328 : vector<16x64xf32>
    %334 = arith.mulf %333, %328 : vector<16x64xf32>
    %335 = arith.addf %328, %334 : vector<16x64xf32>
    %cst_131 = arith.constant 0.797884583 : f32
    %336 = vector.broadcast %cst_131 : f32 to vector<16x64xf32>
    %337 = arith.mulf %336, %335 : vector<16x64xf32>
    %338 = math.tanh %337 : vector<16x64xf32>
    %cst_132 = arith.constant 1.000000e+00 : f32
    %339 = vector.broadcast %cst_132 : f32 to vector<16x64xf32>
    %340 = arith.addf %339, %338 : vector<16x64xf32>
    %341 = arith.mulf %330, %340 : vector<16x64xf32>
    %c1_133 = arith.constant 1 : index
    %c104_134 = arith.constant 104 : index
    %c0_135 = arith.constant 0 : index
    %342 = vector.load %arg3[%c1_133, %c104_134, %c0_135] : memref<2x168x96xf32, #tpu.memory_space<vmem>>, vector<1x64x32xf32>
    %343 = vector.shape_cast %342 : vector<1x64x32xf32> to vector<64x32xf32>
    %cst_136 = arith.constant dense<0.000000e+00> : vector<16x32xf32>
    %344 = tpu.matmul %341, %343, %cst_136 {dimension_numbers = #tpu.dot_dimension_numbers<[1], [0], [0], [1], [0, 0, 1, 1], [], []>} : vector<16x64xf32>, vector<64x32xf32>, vector<16x32xf32> -> vector<16x32xf32>
    %c1_137 = arith.constant 1 : index
    %c5_138 = arith.constant 5 : index
    %c0_139 = arith.constant 0 : index
    %345 = vector.load %arg3[%c1_137, %c5_138, %c0_139] : memref<2x168x96xf32, #tpu.memory_space<vmem>>, vector<1x1x32xf32>
    %346 = vector.shape_cast %345 : vector<1x1x32xf32> to vector<1x32xf32>
    %347 = vector.broadcast %346 : vector<1x32xf32> to vector<16x32xf32>
    %348 = arith.addf %344, %347 : vector<16x32xf32>
    %349 = arith.addf %321, %348 : vector<16x32xf32>
    %c1_140 = arith.constant 1 : index
    %c6_141 = arith.constant 6 : index
    %c0_142 = arith.constant 0 : index
    %350 = vector.load %arg3[%c1_140, %c6_141, %c0_142] : memref<2x168x96xf32, #tpu.memory_space<vmem>>, vector<1x1x32xf32>
    %351 = vector.shape_cast %350 : vector<1x1x32xf32> to vector<1x32xf32>
    %c1_143 = arith.constant 1 : index
    %c7_144 = arith.constant 7 : index
    %c0_145 = arith.constant 0 : index
    %352 = vector.load %arg3[%c1_143, %c7_144, %c0_145] : memref<2x168x96xf32, #tpu.memory_space<vmem>>, vector<1x1x32xf32>
    %353 = vector.shape_cast %352 : vector<1x1x32xf32> to vector<1x32xf32>
    %cst_146 = arith.constant dense<0.000000e+00> : vector<16xf32>
    %354 = vector.multi_reduction <add>, %349, %cst_146 [1] : vector<16x32xf32> to vector<16xf32>
    %355 = vector.shape_cast %354 : vector<16xf32> to vector<16x1xf32>
    %cst_147 = arith.constant 3.200000e+01 : f32
    %356 = vector.broadcast %cst_147 : f32 to vector<16x1xf32>
    %357 = arith.divf %355, %356 : vector<16x1xf32>
    %358 = vector.broadcast %357 : vector<16x1xf32> to vector<16x32xf32>
    %359 = arith.subf %349, %358 : vector<16x32xf32>
    %360 = arith.mulf %359, %359 : vector<16x32xf32>
    %cst_148 = arith.constant dense<0.000000e+00> : vector<16xf32>
    %361 = vector.multi_reduction <add>, %360, %cst_148 [1] : vector<16x32xf32> to vector<16xf32>
    %362 = vector.shape_cast %361 : vector<16xf32> to vector<16x1xf32>
    %cst_149 = arith.constant 3.200000e+01 : f32
    %363 = vector.broadcast %cst_149 : f32 to vector<16x1xf32>
    %364 = arith.divf %362, %363 : vector<16x1xf32>
    %365 = vector.broadcast %357 : vector<16x1xf32> to vector<16x32xf32>
    %366 = arith.subf %349, %365 : vector<16x32xf32>
    %cst_150 = arith.constant 9.99999996E-13 : f32
    %367 = vector.broadcast %cst_150 : f32 to vector<16x1xf32>
    %368 = arith.addf %364, %367 : vector<16x1xf32>
    %369 = math.rsqrt %368 : vector<16x1xf32>
    %370 = vector.broadcast %369 : vector<16x1xf32> to vector<16x32xf32>
    %371 = arith.mulf %366, %370 : vector<16x32xf32>
    %372 = vector.broadcast %351 : vector<1x32xf32> to vector<16x32xf32>
    %373 = arith.mulf %371, %372 : vector<16x32xf32>
    %374 = vector.broadcast %353 : vector<1x32xf32> to vector<16x32xf32>
    %375 = arith.addf %373, %374 : vector<16x32xf32>
    %c40_151 = arith.constant 40 : index
    %c0_152 = arith.constant 0 : index
    %376 = vector.load %arg2[%c40_151, %c0_152] : memref<240x128xf32, #tpu.memory_space<vmem>>, vector<8x16xf32>
    %cst_153 = arith.constant dense<0.000000e+00> : vector<8x32xf32>
    %377 = tpu.matmul %376, %375, %cst_153 {dimension_numbers = #tpu.dot_dimension_numbers<[1], [0], [0], [1], [0, 0, 1, 1], [], []>} : vector<8x16xf32>, vector<16x32xf32>, vector<8x32xf32> -> vector<8x32xf32>
    %c48 = arith.constant 48 : index
    %c0_154 = arith.constant 0 : index
    %378 = vector.load %arg2[%c48, %c0_154] : memref<240x128xf32, #tpu.memory_space<vmem>>, vector<32x32xf32>
    %cst_155 = arith.constant dense<0.000000e+00> : vector<8x32xf32>
    %379 = tpu.matmul %377, %378, %cst_155 {dimension_numbers = #tpu.dot_dimension_numbers<[1], [0], [0], [1], [0, 0, 1, 1], [], []>} : vector<8x32xf32>, vector<32x32xf32>, vector<8x32xf32> -> vector<8x32xf32>
    %c18 = arith.constant 18 : index
    %c0_156 = arith.constant 0 : index
    %380 = vector.load %arg2[%c18, %c0_156] : memref<240x128xf32, #tpu.memory_space<vmem>>, vector<1x32xf32>
    %381 = vector.broadcast %380 : vector<1x32xf32> to vector<8x32xf32>
    %382 = arith.addf %379, %381 : vector<8x32xf32>
    %383 = math.tanh %382 : vector<8x32xf32>
    %c80 = arith.constant 80 : index
    %c0_157 = arith.constant 0 : index
    %384 = vector.load %arg2[%c80, %c0_157] : memref<240x128xf32, #tpu.memory_space<vmem>>, vector<32x128xf32>
    %cst_158 = arith.constant dense<0.000000e+00> : vector<8x128xf32>
    %385 = tpu.matmul %383, %384, %cst_158 {dimension_numbers = #tpu.dot_dimension_numbers<[1], [0], [0], [1], [0, 0, 1, 1], [], []>} : vector<8x32xf32>, vector<32x128xf32>, vector<8x128xf32> -> vector<8x128xf32>
    %c19 = arith.constant 19 : index
    %c0_159 = arith.constant 0 : index
    %386 = vector.load %arg2[%c19, %c0_159] : memref<240x128xf32, #tpu.memory_space<vmem>>, vector<1x128xf32>
    %387 = vector.broadcast %386 : vector<1x128xf32> to vector<8x128xf32>
    %388 = arith.addf %385, %387 : vector<8x128xf32>
    %c0_160 = arith.constant 0 : index
    %c0_161 = arith.constant 0 : index
    %389 = vector.load %arg4[%c0_160, %c0_161] : memref<8x128xf32, #tpu.memory_space<vmem>>, vector<8x128xf32>
    tpu.vector_store %arg4[%c0_160, %c0_161], %388 {strides = array<i32>} : memref<8x128xf32, #tpu.memory_space<vmem>>, vector<8x128xf32>,
    return
  }
  func.func @transform_0(%arg0: i32) -> (i32, i32) {
    %c0_i32 = arith.constant 0 : i32
    %c0_i32_0 = arith.constant 0 : i32
    %c0_i32_1 = arith.constant 0 : i32
    return %c0_i32, %c0_i32_0 : i32, i32
  }
  func.func @transform_1(%arg0: i32) -> (i32, i32) {
    %c0_i32 = arith.constant 0 : i32
    %c0_i32_0 = arith.constant 0 : i32
    %c0_i32_1 = arith.constant 0 : i32
    return %c0_i32, %c0_i32_0 : i32, i32
  }
  func.func @transform_2(%arg0: i32) -> (i32, i32, i32) {
    %c0_i32 = arith.constant 0 : i32
    %c0_i32_0 = arith.constant 0 : i32
    %c0_i32_1 = arith.constant 0 : i32
    %c0_i32_2 = arith.constant 0 : i32
    return %c0_i32, %c0_i32_0, %c0_i32_1 : i32, i32, i32
  }
  func.func @transform_3(%arg0: i32) -> (i32, i32) {
    %c0_i32 = arith.constant 0 : i32
    %c0_i32_0 = arith.constant 0 : i32
    %c0_i32_1 = arith.constant 0 : i32
    return %c0_i32, %c0_i32_0 : i32, i32
  }
}

</mosaic_0001>

<bundles_post_ra>
// kernel: tpu_custom_call.1
= control target key start
LH: loop header
LB: loop body
LE: loop exit
PB: predicated region body
PF: predicated region fallthrough
CT: control target
= control target key end

     0   :  { %8 = vsyncpa [#allocation3], 0  ;;  %s4155_s0 = inlined_call_operand.vmem [shape: s32[16,1], index: 0, kind: input, shape index: {}]   ;;  %s4156_s1 = inlined_call_operand.hbm [shape: f32[240,128], index: 1, kind: input, shape index: {}]   ;;  %s4157_s2 = inlined_call_operand.hbm [shape: f32[2,168,96], index: 2, kind: input, shape index: {}]   ;;  %s4158_s3 = inlined_call_operand.hbm [shape: f32[8,128], index: 3, kind: output, shape index: {}]  }
   0x1   :  { %9 = vsyncpa [#allocation6], 0 }
   0x2   :  { %10 = vsyncpa [#allocation4], 0  ;;  %s3780_s12 = smov [#allocation2]  }
   0x3   :  { %s18_s13 = sshll.u32 %s3780_s12, 4  ;;  %s19_s13 = int_to_ptr.vmem [resolvable:$true] %s18_s13 }
   0x4   :  { %s3722_s14 = scalar_lea.vmem %s19_s13, 3840  ;;  %p3727_p1 = scmp.lt.s32.totalorder %s19_s13, %s19_s13 }
   0x5   :  { %p3723_p0 = scmp.ne.s32.totalorder %s19_s13, %s3722_s14  ;;  %p3728_p2 = scmp.lt.s32.totalorder %s3722_s14, %s3722_s14 }
   0x7   :  { %p3729_p3 = por %p3728_p2, %p3727_p1 }
   0x9   :  { %p3730_p4 = pnand %p3729_p3, %p3723_p0 }
   0xb   :  { %3733 = shalt.err (!%p3730_p4)
}
   0xc   :  { %s3781_s15 = smov 128   ;;  %s3782_s16 = smov 8  }
   0xd   :  { %24 = dma.hbm_to_vmem [thread:$0]  %s4156_s1, 3840, %s19_s13, [#allocation3], %s3781_s15, %s3781_s15, %s3782_s16  }
   0xe   :  { %s3783_s19 = smov [#allocation5]  }
   0xf   :  { %s30_s20 = sshll.u32 %s3783_s19, 4  ;;  %s31_s20 = int_to_ptr.vmem [resolvable:$true] %s30_s20 }
  0x10   :  { %s3742_s21 = scalar_lea.vmem %s31_s20, 5376  ;;  %p3747_p6 = scmp.lt.s32.totalorder %s31_s20, %s31_s20 }
  0x11   :  { %p3743_p5 = scmp.ne.s32.totalorder %s31_s20, %s3742_s21  ;;  %p3748_p7 = scmp.lt.s32.totalorder %s3742_s21, %s3742_s21 }
  0x13   :  { %p3749_p8 = por %p3748_p7, %p3747_p6 }
  0x15   :  { %p3750_p9 = pnand %p3749_p8, %p3743_p5 }
  0x17   :  { %3753 = shalt.err (!%p3750_p9)
}
  0x18   :  { %36 = dma.hbm_to_vmem [thread:$0]  %s4157_s2, 5376, %s31_s20, [#allocation6], %s3781_s15, %s3781_s15, %s3782_s16  }
  0x19   :  { %3774 = dma.done.wait [#allocation3], 3840  }
  0x1a   :  { %3775 = vsyncadd [#allocation3], 4294963456 }
  0x1b   :  { %3776 = dma.done.wait [#allocation6], 5376  }
  0x1c   :  { %3777 = vsyncadd [#allocation6], 4294961920  ;;  %v3784_v0 = vmov 0   ;;  %v43_v1 = vld [vmem:[%s4155_s0] sm:$0xff]  ;;  %v72_v2 = vld [vmem:[#allocation2 + $0xe8] sm:$0xff]  ;;  %v45_v19 = vlaneseq  ;;  %v3785_v22 = vmov 1.0  }
  0x1d   :  { %3617 = vset.pattern.permute.xlu0 %v3784_v0  ;;  %3315 = vmatprep.subr.mxu0 %v72_v2  ;;  %v71_v3 = vld [vmem:[#allocation2 + $0xe0] sm:$0xff]  ;;  %v44_v4 = vld [vmem:[%s4155_s0 + $0x8] sm:$0xff]  ;;  %v70_v5 = vld [vmem:[#allocation2 + $0xd8] sm:$0xff]  ;;  %vm152_vm2 = vcmask 261120   ;;  %vm290_vm3 = vcmask 64512   ;;  %s3786_s0 = smov 96  }
  0x1e   :  { %48 = vperm.xlu0 %3617, %v43_v1   ;;  %3316 = vmatpush3.msra.mxu0 %v72_v2  ;;  %v69_v6 = vld [vmem:[#allocation2 + $0xd0] sm:$0xff]  ;;  %v68_v7 = vld [vmem:[#allocation2 + $0xc8] sm:$0xff]  ;;  %v67_v8 = vld [vmem:[#allocation2 + $0xc0] sm:$0xff]  ;;  %v46_v20 = vand.u32 127, %v45_v19  ;;  %vm378_vm4 = vcmask 130048   ;;  %s3787_s2 = smov 64  }
  0x1f   :  { %3317 = vmatprep.subr.mxu0 %v71_v3  ;;  %v66_v9 = vld [vmem:[#allocation2 + $0xb8] sm:$0xff]  ;;  %v65_v10 = vld [vmem:[#allocation2 + $0xb0] sm:$0xff]  ;;  %v64_v11 = vld [vmem:[#allocation2 + $0xa8] sm:$0xff]  ;;  %s3788_s27 = smov 120   ;;  %s3789_s28 = smov 88   ;;  %vm1128_vm5 = vcmask 195584  }
  0x20   :  { %3318 = vmatpush3.msra.mxu0 %v71_v3  ;;  %v63_v12 = vld [vmem:[#allocation2 + $0xa0] sm:$0xff]  ;;  %v62_v13 = vld [vmem:[#allocation2 + $0x98] sm:$0xff]  ;;  %v61_v14 = vld [vmem:[#allocation2 + $0x90] sm:$0xff]  ;;  %s3790_s29 = smov 112   ;;  %s3791_s30 = smov 80   ;;  %vm1384_vm6 = vcmask 523264  }
  0x21   :  { %3319 = vmatprep.subr.mxu0 %v70_v5  ;;  %v60_v15 = vld [vmem:[#allocation2 + $0x88] sm:$0xff]  ;;  %v59_v16 = vld [vmem:[#allocation2 + $0x80] sm:$0xff]  ;;  %v58_v17 = vld [vmem:[#allocation2 + $0x78] sm:$0xff]  ;;  %s3792_s4 = smov 56   ;;  %s3793_s5 = smov 48   ;;  %vm3800_vm7 = vmmov 0  }
  0x22   :  { %51 = vperm.xlu0 %3617, %v44_v4   ;;  %3320 = vmatpush3.msra.mxu0 %v70_v5  ;;  %v57_v18 = vld [vmem:[#allocation2 + $0x70] sm:$0xff]  ;;  %v73_v25 = vld [vmem:[#allocation2] sm:$0xff]  ;;  %v74_v26 = vld [vmem:[#allocation2 + $0x8] sm:$0xff]  ;;  %s3794_s6 = smov 72   ;;  %s3795_s7 = smov 104  }
  0x23   :  { %3321 = vmatprep.subr.mxu0 %v69_v6  ;;  %v197_v42 = vld [vmem:[#allocation5 + $0x20] sm:$0xff]  ;;  %v196_v43 = vld [vmem:[#allocation5 + $0x18] sm:$0xff]  ;;  %v195_v44 = vld [vmem:[#allocation5 + $0x10] sm:$0xff]  ;;  %s3796_s8 = smov 40   ;;  %s3797_s9 = smov 16  }
  0x24   :  { %3322 = vmatpush3.msra.mxu0 %v69_v6  ;;  %3350 = vmatprep.subr.mxu1 %v197_v42  ;;  %v194_v45 = vld [vmem:[#allocation5 + $0x8] sm:$0xff]  ;;  %v3077_v53 = vld [vmem:[#allocation2 + $0x10] ss:$0 sm:$0xff]  ;;  %v3078_v55 = vld [vmem:[#allocation2 + $0x11] ss:$0 sm:$0xff]  ;;  %s3798_s10 = smov 24  }
  0x25   :  { %3323 = vmatprep.subr.mxu0 %v68_v7  ;;  %3351 = vmatpush3.msra.mxu1 %v197_v42  ;;  %v3079_v62 = vld [vmem:[#allocation5] ss:$0 sm:$0xff]  ;;  %v3864_v6 = vld [vmem:[#allocation2 + $0x20] sm:$0xff]  ;;  %s3801_s11 = smov [#allocation7]  }
  0x26   :  { %3324 = vmatpush3.msra.mxu0 %v68_v7  ;;  %3352 = vmatprep.subr.mxu1 %v196_v43  ;;  %s3065_s12 = sshll.u32 %s3801_s11, 4  ;;  %s3066_s12 = int_to_ptr.vmem [resolvable:$true] %s3065_s12 }
  0x27   :  { %3325 = vmatprep.subr.mxu0 %v67_v8  ;;  %3353 = vmatpush3.msra.mxu1 %v196_v43  ;;  %s3754_s13 = scalar_lea.vmem %s3066_s12, 128  ;;  %p3759_p11 = scmp.lt.s32.totalorder %s3066_s12, %s3066_s12 }
  0x28   :  { %3326 = vmatpush3.msra.mxu0 %v67_v8  ;;  %3354 = vmatprep.subr.mxu1 %v195_v44  ;;  %p3755_p10 = scmp.ne.s32.totalorder %s3066_s12, %s3754_s13  ;;  %p3760_p12 = scmp.lt.s32.totalorder %s3754_s13, %s3754_s13 }
  0x29   :  { %3327 = vmatprep.subr.mxu0 %v66_v9  ;;  %3355 = vmatpush3.msra.mxu1 %v195_v44 }
  0x2a   :  { %3328 = vmatpush3.msra.mxu0 %v66_v9  ;;  %3356 = vmatprep.subr.mxu1 %v194_v45  ;;  %v3866_v9 = vld [vmem:[#allocation2 + $0x18] sm:$0xff]  ;;  %p3761_p13 = por %p3760_p12, %p3759_p11 }
  0x2b   :  { %3329 = vmatprep.subr.mxu0 %v65_v10  ;;  %3357 = vmatpush3.msra.mxu1 %v194_v45 }
  0x2c   :  { %3330 = vmatpush3.msra.mxu0 %v65_v10  ;;  %p3762_p0 = pnand %p3761_p13, %p3755_p10 }
  0x2d   :  { %3331 = vmatprep.subr.mxu0 %v64_v11 }
  0x2e   :  { %3332 = vmatpush3.msra.mxu0 %v64_v11 }
  0x2f   :  { %3333 = vmatprep.subr.mxu0 %v63_v12 }
  0x30   :  { %3334 = vmatpush3.msra.mxu0 %v63_v12 }
  0x31   :  { %3335 = vmatprep.subr.mxu0 %v62_v13 }
  0x32   :  { %3336 = vmatpush3.msra.mxu0 %v62_v13 }
  0x33   :  { %3337 = vmatprep.subr.mxu0 %v61_v14 }
  0x34   :  { %3338 = vmatpush3.msra.mxu0 %v61_v14 }
  0x35   :  { %3339 = vmatprep.subr.mxu0 %v60_v15 }
  0x36   :  { %3340 = vmatpush3.msra.mxu0 %v60_v15 }
  0x37   :  { %3341 = vmatprep.subr.mxu0 %v59_v16 }
  0x38   :  { %3342 = vmatpush3.msra.mxu0 %v59_v16 }
  0x39   :  { %3343 = vmatprep.subr.mxu0 %v58_v17 }
  0x3a   :  { %3344 = vmatpush3.msra.mxu0 %v58_v17 }
  0x3b   :  { %3345 = vmatprep.subr.mxu0 %v57_v18 }
  0x3c   :  { %3346 = vmatpush3.msra.mxu0 %v57_v18 }
  0x99   :  { %v49_v21 = vpop.permute.xlu0 %48 }
  0x9a   :  { %vm53_vm0 = vcmp.eq.s32.totalorder %v46_v20, %v49_v21 }
  0x9b   :  { %3347 = vmatprep.mubr.msk.f32.mxu0 %vm53_vm0, %v3785_v22 }
  0x9d   :  { %v52_v23 = vpop.permute.xlu0 %51 }
  0x9e   :  { %vm54_vm1 = vcmp.eq.s32.totalorder %v46_v20, %v52_v23 }
  0x9f   :  { %3348 = vmatmul.mubr.msk.f32.vlgmr.msra.gmra.mxu0 %vm54_vm1, %v3785_v22 }
 0x15f   :  { %v3349_v24 = vpop.f32.mrf.mxu0 }
 0x160   :  { %v147_v29 = vadd.f32 %v3349_v24, %v74_v26 }
 0x161   :  { %v141_v27 = vpop.f32.mrf.mxu0 }
 0x162   :  { %v142_v28 = vadd.f32 %v141_v27, %v73_v25  ;;  %v156_v31 = vsel %vm152_vm2, %v147_v29, 0.0 }
 0x164   :  { %v153_v30 = vsel %vm152_vm2, %v142_v28, 0.0 }
 0x165   :  { %154 = vadd.xlane.f32.xlu1 %v153_v30 }
 0x169   :  { %157 = vadd.xlane.f32.xlu1 %v156_v31 }
 0x1ee   :  { %v155_v32 = vpop.xlane.xlu1 %154 }
 0x1ef   :  { %v160_v33 = vmul.f32 0.03125, %v155_v32 }
 0x1f1   :  { %v162_v34 = vsub.f32 %v142_v28, %v160_v33 }
 0x1f2   :  { %v158_v35 = vpop.xlane.xlu1 %157 }
 0x1f3   :  { %v161_v36 = vmul.f32 0.03125, %v158_v35  ;;  %v164_v37 = vmul.f32 %v162_v34, %v162_v34 }
 0x1f5   :  { %v163_v38 = vsub.f32 %v147_v29, %v161_v36  ;;  %v166_v39 = vsel %vm152_vm2, %v164_v37, 0.0 }
 0x1f6   :  { %167 = vadd.xlane.f32.xlu0 %v166_v39 }
 0x1f7   :  { %v165_v40 = vmul.f32 %v163_v38, %v163_v38 }
 0x1f9   :  { %v169_v41 = vsel %vm152_vm2, %v165_v40, 0.0 }
 0x1fa   :  { %170 = vadd.xlane.f32.xlu1 %v169_v41 }
 0x27f   :  { %v168_v46 = vpop.xlane.xlu0 %167 }
 0x280   :  { %v172_v47 = vmul.f32 0.03125, %v168_v46 }
 0x282   :  { %v174_v48 = vadd.f32 1e-12, %v172_v47 }
 0x283   :  { %v171_v49 = vpop.xlane.xlu1 %170 }
 0x284   :  { %3618 = vrsqrt.f32 %v174_v48  ;;  %v173_v50 = vmul.f32 0.03125, %v171_v49 }
 0x286   :  { %v175_v51 = vadd.f32 1e-12, %v173_v50 }
 0x288   :  { %3620 = vrsqrt.f32 %v175_v51 }
 0x291   :  { %v3619_v52 = vpop.eup %3618 }
 0x292   :  { %v178_v54 = vmul.f32 %v3619_v52, %v162_v34 }
 0x294   :  { %v184_v56 = vmul.f32 %v3077_v53, %v178_v54 }
 0x295   :  { %v3621_v57 = vpop.eup %3620 }
 0x296   :  { %v179_v58 = vmul.f32 %v3621_v57, %v163_v38  ;;  %v3840_v59 = vadd.f32 %v3078_v55, %v184_v56 }
 0x298   :  { %v185_v60 = vmul.f32 %v3077_v53, %v179_v58  ;;  %3358 = vmatprep.mubr.msk.f32.mxu1 %vm152_vm2, %v3840_v59 }
 0x29a   :  { %v3844_v61 = vadd.f32 %v3078_v55, %v185_v60 }
 0x29c   :  { %3359 = vmatmul.mubr.msk.f32.vlgmr.msra.gmra.mxu1 %vm152_vm2, %v3844_v61 }
 0x35c   :  { %v3360_v63 = vpop.f32.mrf.mxu1 }
 0x35d   :  { %v3848_v0 = vadd.f32 %v3360_v63, %v3079_v62 }
 0x35e   :  { %v275_v1 = vpop.f32.mrf.mxu1 }
 0x35f   :  { %v3850_v2 = vadd.f32 %v3079_v62, %v275_v1  ;;  %288 = vrot.lane.b32.xlu1 %v3848_v0, %s3786_s0 }
 0x361   :  { %3365 = vmatprep.mubr.msk.f32.mxu1 %vm290_vm3, %v3850_v2 }
 0x363   :  { %286 = vrot.lane.b32.xlu1 %v3850_v2, %s3786_s0 }
 0x3d1   :  { %v289_v3 = vpop.permute.xlu1 %288 }
 0x3d2   :  { %3361 = vmatprep.subr.msk.mxu1 %vm290_vm3, %v289_v3 }
 0x3d3   :  { %3362 = vmatpush3.xpose.msk.msra.mxu1 %vm290_vm3, %v289_v3 }
 0x3d5   :  { %v287_v4 = vpop.permute.xlu1 %286 }
 0x3d6   :  { %3363 = vmatprep.subr.msk.mxu1 %vm290_vm3, %v287_v4 }
 0x3d7   :  { %3364 = vmatpush3.xpose.msk.msra.mxu1 %vm290_vm3, %v287_v4 }
 0x3da   :  { %3366 = vmatmul.mubr.msk.f32.vlgmr.msra.gmra.mxu1 %vm290_vm3, %v3848_v0 }
 0x49a   :  { %v3367_v5 = vpop.f32.mrf.mxu1 }
 0x49b   :  { %v375_v7 = vmul.f32 0.35355338, %v3367_v5 }
 0x49c   :  { %v365_v8 = vpop.f32.mrf.mxu1 }
 0x49d   :  { %v374_v10 = vmul.f32 0.35355338, %v365_v8  ;;  %v377_v11 = vadd.f32 %v375_v7, %v3864_v6 }
 0x49f   :  { %v382_v12 = vsel %vm378_vm4, %v377_v11, -inf  ;;  %v376_v13 = vadd.f32 %v374_v10, %v3866_v9 }
 0x4a0   :  { %383 = vmax.xlane.f32.xlu0 %v382_v12 }
 0x4a1   :  { %v379_v14 = vsel %vm378_vm4, %v376_v13, -inf }
 0x4a2   :  { %380 = vmax.xlane.f32.xlu1 %v379_v14 }
 0x4b3   :  { %401 = vrot.lane.b32.xlu1 %v3850_v2, %s3787_s2 }
 0x4b6   :  { %403 = vrot.lane.b32.xlu0 %v3848_v0, %s3787_s2 }
 0x4b7   :  { %490 = vrot.lane.b32.xlu1 %v3848_v0, %s3788_s27 }
 0x4ba   :  { %494 = vrot.lane.b32.xlu0 %v3848_v0, %s3789_s28 }
 0x4bb   :  { %692 = vrot.lane.b32.xlu1 %v3850_v2, %s3790_s29 }
 0x4be   :  { %492 = vrot.lane.b32.xlu0 %v3850_v2, %s3789_s28 }
 0x529   :  { %v384_v15 = vpop.xlane.xlu0 %383 }
 0x52a   :  { %v386_v16 = vsub.f32 %v377_v11, %v384_v15 }
 0x52b   :  { %v381_v17 = vpop.xlane.xlu1 %380 }
 0x52c   :  { %v389_v18 = vmul.f32 1.442695, %v386_v16  ;;  %v385_v19 = vsub.f32 %v376_v13, %v381_v17 }
 0x52d   :  { %v404_v20 = vpop.permute.xlu0 %403 }
 0x52e   :  { %3622 = vpow2.f32 %v389_v18  ;;  %v387_v21 = vmul.f32 1.442695, %v385_v19  ;;  %3368 = vmatprep.subr.mxu1 %v404_v20 }
 0x52f   :  { %3369 = vmatpush3.msra.mxu1 %v404_v20  ;;  %v402_v22 = vpop.permute.xlu1 %401 }
 0x530   :  { %3624 = vpow2.f32 %v387_v21  ;;  %3370 = vmatprep.subr.mxu1 %v402_v22 }
 0x531   :  { %v495_v23 = vpop.permute.xlu0 %494  ;;  %3371 = vmatpush3.msra.mxu1 %v402_v22 }
 0x532   :  { %3375 = vmatprep.subr.msk.mxu1 %vm290_vm3, %v495_v23 }
 0x533   :  { %v491_v24 = vpop.permute.xlu1 %490 }
 0x535   :  { %v493_v30 = vpop.permute.xlu0 %492 }
 0x537   :  { %v693_v25 = vpop.permute.xlu1 %692 }
 0x538   :  { %3393 = vmatprep.mubr.msk.f32.mxu0 %vm290_vm3, %v693_v25 }
 0x53b   :  { %v3623_v26 = vpop.eup %3622 }
 0x53c   :  { %v394_v27 = vsel %vm378_vm4, %v3623_v26, 0.0 }
 0x53d   :  { %v3625_v28 = vpop.eup %3624  ;;  %395 = vadd.xlane.f32.xlu0 %v394_v27 }
 0x53e   :  { %v391_v29 = vsel %vm378_vm4, %v3625_v28, 0.0 }
 0x541   :  { %392 = vadd.xlane.f32.xlu0 %v391_v29 }
 0x557   :  { %698 = vrot.lane.b32.xlu0 %v3848_v0, %s3791_s30 }
 0x55b   :  { %488 = vrot.lane.b32.xlu0 %v3850_v2, %s3788_s27 }
 0x55f   :  { %696 = vrot.lane.b32.xlu0 %v3850_v2, %s3791_s30 }
 0x563   :  { %694 = vrot.lane.b32.xlu0 %v3848_v0, %s3790_s29 }
 0x5c6   :  { %v396_v31 = vpop.xlane.xlu0 %395 }
 0x5c7   :  { %3626 = vrcp.f32 %v396_v31 }
 0x5ca   :  { %v393_v32 = vpop.xlane.xlu0 %392 }
 0x5cb   :  { %3628 = vrcp.f32 %v393_v32 }
 0x5ce   :  { %v699_v33 = vpop.permute.xlu0 %698 }
 0x5cf   :  { %3389 = vmatprep.subr.msk.mxu0 %vm290_vm3, %v699_v33 }
 0x5d0   :  { %3390 = vmatpush3.xpose.msk.msra.mxu0 %vm290_vm3, %v699_v33 }
 0x5d2   :  { %v489_v34 = vpop.permute.xlu0 %488 }
 0x5d4   :  { %v3627_v36 = vpop.eup %3626 }
 0x5d5   :  { %v400_v40 = vmul.f32 %v3627_v36, %v3623_v26 }
 0x5d6   :  { %v697_v35 = vpop.permute.xlu0 %696 }
 0x5d7   :  { %3391 = vmatprep.subr.msk.mxu0 %vm290_vm3, %v697_v35 }
 0x5d8   :  { %v3629_v37 = vpop.eup %3628  ;;  %3392 = vmatpush3.xpose.msk.msra.mxu0 %vm290_vm3, %v697_v35 }
 0x5d9   :  { %v399_v38 = vmul.f32 %v3629_v37, %v3625_v28 }
 0x5da   :  { %v695_v39 = vpop.permute.xlu0 %694 }
 0x5db   :  { %3372 = vmatprep.mubr.msk.f32.mxu1 %vm378_vm4, %v399_v38  ;;  %3394 = vmatmul.mubr.msk.f32.vlgmr.msra.gmra.mxu0 %vm290_vm3, %v695_v39 }
 0x5dc   :  { %3373 = vmatmul.mubr.msk.f32.vlgmr.msra.gmra.mxu1 %vm378_vm4, %v400_v40 }
 0x5dd   :  { %3376 = vmatpush3.xpose.msk.msra.mxu1 %vm290_vm3, %v495_v23  ;;  %3379 = vmatprep.mubr.msk.f32.mxu1 %vm290_vm3, %v489_v34 }
 0x5de   :  { %3377 = vmatprep.subr.msk.mxu1 %vm290_vm3, %v493_v30 }
 0x5e1   :  { %3378 = vmatpush3.xpose.msk.msra.mxu1 %vm290_vm3, %v493_v30 }
 0x5e4   :  { %3380 = vmatmul.mubr.msk.f32.vlgmr.msra.gmra.mxu1 %vm290_vm3, %v491_v24 }
 0x69b   :  { %v3395_v41 = vpop.f32.mrf.mxu0 }
 0x69c   :  { %v3908_v42 = vpop.f32.mrf.mxu1  ;;  %v784_v49 = vmul.f32 0.35355338, %v3395_v41 }
 0x69d   :  { %v774_v43 = vpop.f32.mrf.mxu0 }
 0x69e   :  { %v3910_v44 = vpop.f32.mrf.mxu1  ;;  %v783_v46 = vmul.f32 0.35355338, %v774_v43  ;;  %v786_v56 = vadd.f32 %v784_v49, %v3864_v6 }
 0x6a0   :  { %v785_v54 = vadd.f32 %v783_v46, %v3866_v9  ;;  %v790_v58 = vsel %vm378_vm4, %v786_v56, -inf }
 0x6a2   :  { %v787_v57 = vsel %vm378_vm4, %v785_v54, -inf }
 0x6a4   :  { %v3381_v45 = vpop.f32.mrf.mxu1 }
 0x6a5   :  { %v580_v47 = vmul.f32 0.35355338, %v3381_v45 }
 0x6a6   :  { %v570_v48 = vpop.f32.mrf.mxu1 }
 0x6a7   :  { %v579_v50 = vmul.f32 0.35355338, %v570_v48  ;;  %v582_v51 = vadd.f32 %v580_v47, %v3864_v6 }
 0x6a9   :  { %v586_v52 = vsel %vm378_vm4, %v582_v51, -inf  ;;  %v581_v53 = vadd.f32 %v579_v50, %v3866_v9 }
 0x6aa   :  { %587 = vmax.xlane.f32.xlu0 %v586_v52 }
 0x6ab   :  { %v583_v55 = vsel %vm378_vm4, %v581_v53, -inf }
 0x6ac   :  { %584 = vmax.xlane.f32.xlu1 %v583_v55 }
 0x6ae   :  { %788 = vmax.xlane.f32.xlu0 %v787_v57 }
 0x6b0   :  { %791 = vmax.xlane.f32.xlu1 %v790_v58 }
 0x733   :  { %v588_v60 = vpop.xlane.xlu0 %587 }
 0x734   :  { %v590_v15 = vsub.f32 %v582_v51, %v588_v60 }
 0x735   :  { %v585_v62 = vpop.xlane.xlu1 %584 }
 0x736   :  { %v589_v13 = vsub.f32 %v581_v53, %v585_v62  ;;  %v593_v16 = vmul.f32 1.442695, %v590_v15  ;;  %v1132_v15 = vld [vmem:[#allocation5 + $0x30] sm:$0xff] }
 0x737   :  { %v789_v63 = vpop.xlane.xlu0 %788 }
 0x738   :  { %v793_v1 = vsub.f32 %v785_v54, %v789_v63  ;;  %v591_v14 = vmul.f32 1.442695, %v589_v13  ;;  %v1134_v13 = vld [vmem:[#allocation5 + $0x40] sm:$0xff] }
 0x739   :  { %v792_v3 = vpop.xlane.xlu1 %791 }
 0x73a   :  { %v795_v4 = vmul.f32 1.442695, %v793_v1  ;;  %v794_v5 = vsub.f32 %v786_v56, %v792_v3 }
 0x73c   :  { %3630 = vpow2.f32 %v795_v4  ;;  %v797_v7 = vmul.f32 1.442695, %v794_v5 }
 0x73e   :  { %3632 = vpow2.f32 %v797_v7 }
 0x73f   :  { %3634 = vpow2.f32 %v591_v14  ;;  %v1133_v14 = vld [vmem:[#allocation5 + $0x38] sm:$0xff] }
 0x740   :  { %3636 = vpow2.f32 %v593_v16  ;;  %v1131_v16 = vld [vmem:[#allocation5 + $0x28] sm:$0xff] }
 0x749   :  { %v3631_v8 = vpop.eup %3630 }
 0x74a   :  { %v799_v10 = vsel %vm378_vm4, %v3631_v8, 0.0 }
 0x74b   :  { %v3633_v11 = vpop.eup %3632  ;;  %800 = vadd.xlane.f32.xlu0 %v799_v10 }
 0x74c   :  { %v802_v12 = vsel %vm378_vm4, %v3633_v11, 0.0  ;;  %v3635_v17 = vpop.eup %3634 }
 0x74d   :  { %803 = vadd.xlane.f32.xlu1 %v802_v12  ;;  %v595_v18 = vsel %vm378_vm4, %v3635_v17, 0.0  ;;  %v3637_v19 = vpop.eup %3636 }
 0x74e   :  { %v598_v20 = vsel %vm378_vm4, %v3637_v19, 0.0 }
 0x75e   :  { %605 = vrot.lane.b32.xlu1 %v3850_v2, %s3792_s4 }
 0x761   :  { %607 = vrot.lane.b32.xlu0 %v3848_v0, %s3792_s4 }
 0x762   :  { %811 = vrot.lane.b32.xlu1 %v3848_v0, %s3793_s5 }
 0x780   :  { %596 = vadd.xlane.f32.xlu0 %v595_v18 }
 0x786   :  { %599 = vadd.xlane.f32.xlu1 %v598_v20 }
 0x796   :  { %809 = vrot.lane.b32.xlu0 %v3850_v2, %s3793_s5 }
 0x797   :  { %902 = vrot.lane.b32.xlu1 %v3848_v0, %s3794_s6 }
 0x79a   :  { %900 = vrot.lane.b32.xlu0 %v3850_v2, %s3794_s6 }
 0x79b   :  { %896 = vrot.lane.b32.xlu1 %v3850_v2, %s3795_s7 }
 0x79e   :  { %898 = vrot.lane.b32.xlu0 %v3848_v0, %s3795_s7 }
 0x7d4   :  { %v801_v21 = vpop.xlane.xlu0 %800 }
 0x7d6   :  { %v804_v22 = vpop.xlane.xlu1 %803 }
 0x7d8   :  { %v608_v23 = vpop.permute.xlu0 %607 }
 0x7d9   :  { %3382 = vmatprep.subr.mxu1 %v608_v23 }
 0x7da   :  { %3383 = vmatpush3.msra.mxu1 %v608_v23  ;;  %v606_v24 = vpop.permute.xlu1 %605 }
 0x7db   :  { %3384 = vmatprep.subr.mxu1 %v606_v24 }
 0x7dc   :  { %3385 = vmatpush3.msra.mxu1 %v606_v24 }
 0x7de   :  { %v812_v25 = vpop.permute.xlu1 %811 }
 0x7df   :  { %3396 = vmatprep.subr.mxu1 %v812_v25 }
 0x809   :  { %v597_v26 = vpop.xlane.xlu0 %596 }
 0x80a   :  { %3638 = vrcp.f32 %v597_v26 }
 0x80b   :  { %3640 = vrcp.f32 %v801_v21 }
 0x80d   :  { %v810_v35 = vpop.permute.xlu0 %809 }
 0x80f   :  { %v600_v27 = vpop.xlane.xlu1 %599 }
 0x810   :  { %3642 = vrcp.f32 %v600_v27 }
 0x811   :  { %3644 = vrcp.f32 %v804_v22  ;;  %v901_v39 = vpop.permute.xlu0 %900 }
 0x813   :  { %v903_v32 = vpop.permute.xlu1 %902 }
 0x815   :  { %v899_v40 = vpop.permute.xlu0 %898 }
 0x817   :  { %v3639_v28 = vpop.eup %3638  ;;  %v897_v38 = vpop.permute.xlu1 %896 }
 0x818   :  { %v603_v29 = vmul.f32 %v3639_v28, %v3635_v17  ;;  %v3641_v30 = vpop.eup %3640 }
 0x819   :  { %v807_v36 = vmul.f32 %v3641_v30, %v3631_v8 }
 0x81a   :  { %3386 = vmatprep.mubr.msk.f32.mxu1 %vm378_vm4, %v603_v29 }
 0x81d   :  { %v3643_v31 = vpop.eup %3642 }
 0x81e   :  { %v604_v33 = vmul.f32 %v3643_v31, %v3637_v19  ;;  %v3645_v34 = vpop.eup %3644  ;;  %v3106_v31 = vld [vmem:[#allocation5 + $0x1] ss:$0 sm:$0xff] }
 0x81f   :  { %v808_v37 = vmul.f32 %v3645_v34, %v3633_v11 }
 0x820   :  { %3387 = vmatmul.mubr.msk.f32.vlgmr.msra.gmra.mxu1 %vm378_vm4, %v604_v33 }
 0x821   :  { %3397 = vmatpush3.msra.mxu1 %v812_v25  ;;  %3400 = vmatprep.mubr.msk.f32.mxu1 %vm378_vm4, %v807_v36 }
 0x822   :  { %3398 = vmatprep.subr.mxu1 %v810_v35 }
 0x823   :  { %3399 = vmatpush3.msra.mxu1 %v810_v35 }
 0x824   :  { %3403 = vmatprep.subr.msk.mxu1 %vm290_vm3, %v903_v32  ;;  %3401 = vmatmul.mubr.msk.f32.vlgmr.msra.gmra.mxu1 %vm378_vm4, %v808_v37 }
 0x825   :  { %3404 = vmatpush3.xpose.msk.msra.mxu1 %vm290_vm3, %v903_v32  ;;  %3407 = vmatprep.mubr.msk.f32.mxu1 %vm290_vm3, %v897_v38 }
 0x826   :  { %3405 = vmatprep.subr.msk.mxu1 %vm290_vm3, %v901_v39 }
 0x829   :  { %3406 = vmatpush3.xpose.msk.msra.mxu1 %vm290_vm3, %v901_v39 }
 0x82c   :  { %3408 = vmatmul.mubr.msk.f32.vlgmr.msra.gmra.mxu1 %vm290_vm3, %v899_v40 }
 0x8e0   :  { %v3388_v41 = vpop.f32.mrf.mxu1 }
 0x8e2   :  { %v683_v43 = vpop.f32.mrf.mxu1 }
 0x8e4   :  { %v3402_v45 = vpop.f32.mrf.mxu1 }
 0x8e6   :  { %v887_v46 = vpop.f32.mrf.mxu1 }
 0x8ec   :  { %v3409_v47 = vpop.f32.mrf.mxu1 }
 0x8ed   :  { %v988_v48 = vmul.f32 0.35355338, %v3409_v47 }
 0x8ee   :  { %v978_v49 = vpop.f32.mrf.mxu1 }
 0x8ef   :  { %v987_v50 = vmul.f32 0.35355338, %v978_v49  ;;  %v990_v51 = vadd.f32 %v988_v48, %v3864_v6  ;;  %v1266_v49 = vld [vmem:[#allocation5 + $0x60] sm:$0xff] }
 0x8f0   :  { %3428 = vmatprep.subr.mxu1 %v1266_v49 }
 0x8f1   :  { %v994_v52 = vsel %vm378_vm4, %v990_v51, -inf  ;;  %v989_v53 = vadd.f32 %v987_v50, %v3866_v9  ;;  %3429 = vmatpush3.msra.mxu1 %v1266_v49  ;;  %v1264_v50 = vld [vmem:[#allocation5 + $0x50] sm:$0xff] }
 0x8f2   :  { %995 = vmax.xlane.f32.xlu0 %v994_v52 }
 0x8f3   :  { %v991_v54 = vsel %vm378_vm4, %v989_v53, -inf }
 0x8f4   :  { %992 = vmax.xlane.f32.xlu1 %v991_v54 }
 0x97b   :  { %v996_v55 = vpop.xlane.xlu0 %995 }
 0x97c   :  { %v998_v56 = vsub.f32 %v990_v51, %v996_v55  ;;  %v1263_v51 = vld [vmem:[#allocation5 + $0x48] sm:$0xff] }
 0x97d   :  { %v993_v57 = vpop.xlane.xlu1 %992 }
 0x97e   :  { %v1001_v58 = vmul.f32 1.442695, %v998_v56  ;;  %v997_v60 = vsub.f32 %v989_v53, %v993_v57 }
 0x980   :  { %3646 = vpow2.f32 %v1001_v58  ;;  %v999_v62 = vmul.f32 1.442695, %v997_v60  ;;  %v3109_v60 = vld [vmem:[#allocation5 + $0x2] ss:$0 sm:$0xff] }
 0x982   :  { %3648 = vpow2.f32 %v999_v62 }
 0x98d   :  { %v3647_v63 = vpop.eup %3646 }
 0x98e   :  { %v1006_v1 = vsel %vm378_vm4, %v3647_v63, 0.0 }
 0x98f   :  { %v3649_v3 = vpop.eup %3648  ;;  %1007 = vadd.xlane.f32.xlu1 %v1006_v1 }
 0x990   :  { %v1003_v4 = vsel %vm378_vm4, %v3649_v3, 0.0 }
 0x991   :  { %1004 = vadd.xlane.f32.xlu0 %v1003_v4  ;;  %v3110_v4 = vld [vmem:[#allocation5 + $0x3] ss:$0 sm:$0xff] }
 0x9a0   :  { %1013 = vrot.lane.b32.xlu1 %v3850_v2, %s3796_s8 }
 0x9a4   :  { %1102 = vrot.lane.b32.xlu1 %v683_v43, %s3782_s16 }
 0x9a7   :  { %1015 = vrot.lane.b32.xlu0 %v3848_v0, %s3796_s8 }
 0x9a8   :  { %1110 = vrot.lane.b32.xlu1 %v887_v46, %s3797_s9 }
 0x9ab   :  { %1104 = vrot.lane.b32.xlu0 %v3388_v41, %s3782_s16 }
 0x9af   :  { %1112 = vrot.lane.b32.xlu0 %v3402_v45, %s3797_s9 }
 0xa18   :  { %v1008_v5 = vpop.xlane.xlu1 %1007 }
 0xa19   :  { %3650 = vrcp.f32 %v1008_v5 }
 0xa1a   :  { %v1005_v7 = vpop.xlane.xlu0 %1004 }
 0xa1b   :  { %3652 = vrcp.f32 %v1005_v7 }
 0xa1c   :  { %v1014_v10 = vpop.permute.xlu1 %1013 }
 0xa1e   :  { %v1016_v8 = vpop.permute.xlu0 %1015 }
 0xa1f   :  { %3410 = vmatprep.subr.mxu0 %v1016_v8 }
 0xa20   :  { %3411 = vmatpush3.msra.mxu0 %v1016_v8  ;;  %v1103_v20 = vpop.permute.xlu1 %1102 }
 0xa21   :  { %3412 = vmatprep.subr.mxu0 %v1014_v10  ;;  %v1124_v23 = vsel %vm290_vm3, %v3910_v44, %v1103_v20 }
 0xa22   :  { %3413 = vmatpush3.msra.mxu0 %v1014_v10  ;;  %v1105_v19 = vpop.permute.xlu0 %1104  ;;  %v1378_v10 = vld [vmem:[#allocation5 + $0xa0] sm:$0xff] }
 0xa23   :  { %3417 = vmatprep.subr.mxu0 %v1134_v13  ;;  %v1125_v25 = vsel %vm290_vm3, %v3908_v42, %v1105_v19 }
 0xa24   :  { %v1111_v22 = vpop.permute.xlu1 %1110 }
 0xa25   :  { %v1126_v26 = vsel %vm378_vm4, %v1124_v23, %v1111_v22 }
 0xa26   :  { %v3651_v2 = vpop.eup %3650  ;;  %v1113_v21 = vpop.permute.xlu0 %1112 }
 0xa27   :  { %v1012_v12 = vmul.f32 %v3651_v2, %v3647_v63  ;;  %v1127_v28 = vsel %vm378_vm4, %v1125_v25, %v1113_v21  ;;  %v1377_v2 = vld [vmem:[#allocation5 + $0x98] sm:$0xff] }
 0xa28   :  { %v3653_v11 = vpop.eup %3652 }
 0xa29   :  { %v1011_v0 = vmul.f32 %v3653_v11, %v3649_v3  ;;  %v1376_v11 = vld [vmem:[#allocation5 + $0x90] sm:$0xff] }
 0xa2b   :  { %3414 = vmatprep.mubr.msk.f32.mxu0 %vm378_vm4, %v1011_v0  ;;  %v1375_v0 = vld [vmem:[#allocation5 + $0x88] sm:$0xff] }
 0xa2c   :  { %3415 = vmatmul.mubr.msk.f32.vlgmr.msra.gmra.mxu0 %vm378_vm4, %v1012_v12  ;;  %v1374_v12 = vld [vmem:[#allocation5 + $0x80] sm:$0xff] }
 0xa2d   :  { %3418 = vmatpush3.msra.mxu0 %v1134_v13  ;;  %v1373_v13 = vld [vmem:[#allocation5 + $0x78] sm:$0xff] }
 0xa2e   :  { %3419 = vmatprep.subr.mxu0 %v1133_v14 }
 0xa2f   :  { %3420 = vmatpush3.msra.mxu0 %v1133_v14  ;;  %v1372_v14 = vld [vmem:[#allocation5 + $0x70] sm:$0xff] }
 0xa30   :  { %3421 = vmatprep.subr.mxu0 %v1132_v15 }
 0xa31   :  { %3422 = vmatpush3.msra.mxu0 %v1132_v15  ;;  %v1371_v15 = vld [vmem:[#allocation5 + $0x68] sm:$0xff] }
 0xa32   :  { %3423 = vmatprep.subr.mxu0 %v1131_v16 }
 0xa33   :  { %3424 = vmatpush3.msra.mxu0 %v1131_v16  ;;  %v3111_v16 = vld [vmem:[#allocation5 + $0x4] ss:$0 sm:$0xff] }
 0xa34   :  { %3439 = vmatprep.subr.mxu0 %v1378_v10 }
 0xaec   :  { %v3416_v17 = vpop.f32.mrf.mxu0 }
 0xaed   :  { %1120 = vrot.lane.b32.xlu0 %v3416_v17, %s3798_s10 }
 0xaee   :  { %v1091_v18 = vpop.f32.mrf.mxu0 }
 0xaef   :  { %1118 = vrot.lane.b32.xlu1 %v1091_v18, %s3798_s10 }
 0xb5f   :  { %v1121_v24 = vpop.permute.xlu0 %1120 }
 0xb60   :  { %v1130_v30 = vsel %vm1128_vm5, %v1127_v28, %v1121_v24 }
 0xb61   :  { %v1119_v27 = vpop.permute.xlu1 %1118 }
 0xb62   :  { %v1129_v29 = vsel %vm1128_vm5, %v1126_v26, %v1119_v27 }
 0xb63   :  { %3425 = vmatprep.mubr.msk.f32.mxu0 %vm152_vm2, %v1129_v29 }
 0xb64   :  { %3426 = vmatmul.mubr.msk.f32.vlgmr.msra.gmra.mxu0 %vm152_vm2, %v1130_v30 }
 0xb65   :  { %3440 = vmatpush3.msra.mxu0 %v1378_v10 }
 0xb66   :  { %3441 = vmatprep.subr.mxu0 %v1377_v2 }
 0xb67   :  { %3442 = vmatpush3.msra.mxu0 %v1377_v2 }
 0xb68   :  { %3443 = vmatprep.subr.mxu0 %v1376_v11 }
 0xb69   :  { %3444 = vmatpush3.msra.mxu0 %v1376_v11 }
 0xb6a   :  { %3445 = vmatprep.subr.mxu0 %v1375_v0 }
 0xb6b   :  { %3446 = vmatpush3.msra.mxu0 %v1375_v0 }
 0xb6c   :  { %3447 = vmatprep.subr.mxu0 %v1374_v12 }
 0xb6d   :  { %3448 = vmatpush3.msra.mxu0 %v1374_v12  ;;  %v3118_v12 = vld [vmem:[#allocation5 + $0x7] ss:$0 sm:$0xff] }
 0xb6e   :  { %3449 = vmatprep.subr.mxu0 %v1373_v13 }
 0xb6f   :  { %3450 = vmatpush3.msra.mxu0 %v1373_v13 }
 0xb70   :  { %3451 = vmatprep.subr.mxu0 %v1372_v14 }
 0xb71   :  { %3452 = vmatpush3.msra.mxu0 %v1372_v14 }
 0xb72   :  { %3453 = vmatprep.subr.mxu0 %v1371_v15 }
 0xb73   :  { %3454 = vmatpush3.msra.mxu0 %v1371_v15 }
 0xc24   :  { %v3427_v44 = vpop.f32.mrf.mxu0 }
 0xc25   :  { %v1218_v32 = vadd.f32 %v3427_v44, %v3106_v31 }
 0xc26   :  { %v1212_v33 = vpop.f32.mrf.mxu0 }
 0xc27   :  { %v1213_v34 = vadd.f32 %v3106_v31, %v1212_v33  ;;  %v1222_v42 = vadd.f32 %v1218_v32, %v3844_v61 }
 0xc29   :  { %v1228_v35 = vsel %vm152_vm2, %v1222_v42, 0.0  ;;  %v1221_v36 = vadd.f32 %v1213_v34, %v3840_v59  ;;  %v1265_v59 = vld [vmem:[#allocation5 + $0x58] sm:$0xff] }
 0xc2a   :  { %1229 = vadd.xlane.f32.xlu0 %v1228_v35  ;;  %3430 = vmatprep.subr.mxu1 %v1265_v59 }
 0xc2b   :  { %v1225_v37 = vsel %vm152_vm2, %v1221_v36, 0.0  ;;  %3431 = vmatpush3.msra.mxu1 %v1265_v59 }
 0xc2c   :  { %1226 = vadd.xlane.f32.xlu1 %v1225_v37  ;;  %3432 = vmatprep.subr.mxu1 %v1264_v50  ;;  %v3114_v37 = vld [vmem:[#allocation5 + $0x5] ss:$0 sm:$0xff] }
 0xc2d   :  { %3433 = vmatpush3.msra.mxu1 %v1264_v50 }
 0xc2e   :  { %3434 = vmatprep.subr.mxu1 %v1263_v51 }
 0xc2f   :  { %3435 = vmatpush3.msra.mxu1 %v1263_v51 }
 0xcb3   :  { %v1230_v38 = vpop.xlane.xlu0 %1229 }
 0xcb4   :  { %v1232_v39 = vmul.f32 0.03125, %v1230_v38 }
 0xcb5   :  { %v1227_v40 = vpop.xlane.xlu1 %1226 }
 0xcb6   :  { %v1234_v41 = vsub.f32 %v1222_v42, %v1232_v39  ;;  %v1231_v43 = vmul.f32 0.03125, %v1227_v40 }
 0xcb8   :  { %v1233_v45 = vsub.f32 %v1221_v36, %v1231_v43  ;;  %v1236_v46 = vmul.f32 %v1234_v41, %v1234_v41 }
 0xcba   :  { %v1240_v47 = vsel %vm152_vm2, %v1236_v46, 0.0  ;;  %v1235_v48 = vmul.f32 %v1233_v45, %v1233_v45 }
 0xcbb   :  { %1241 = vadd.xlane.f32.xlu1 %v1240_v47 }
 0xcbc   :  { %v1237_v61 = vsel %vm152_vm2, %v1235_v48, 0.0 }
 0xcbd   :  { %1238 = vadd.xlane.f32.xlu0 %v1237_v61 }
 0xd44   :  { %v1242_v52 = vpop.xlane.xlu1 %1241 }
 0xd45   :  { %v1244_v53 = vmul.f32 0.03125, %v1242_v52 }
 0xd46   :  { %v1239_v54 = vpop.xlane.xlu0 %1238 }
 0xd47   :  { %v1246_v55 = vadd.f32 1e-12, %v1244_v53  ;;  %v1243_v56 = vmul.f32 0.03125, %v1239_v54 }
 0xd49   :  { %3654 = vrsqrt.f32 %v1246_v55  ;;  %v1245_v57 = vadd.f32 1e-12, %v1243_v56  ;;  %v1512_v56 = vld [vmem:[#allocation5 + $0xc8] sm:$0xff] }
 0xd4a   :  { %3458 = vmatprep.subr.mxu1 %v1512_v56 }
 0xd4b   :  { %3656 = vrsqrt.f32 %v1245_v57  ;;  %v1511_v57 = vld [vmem:[#allocation5 + $0xc0] sm:$0xff] }
 0xd56   :  { %v3655_v58 = vpop.eup %3654 }
 0xd57   :  { %v1250_v62 = vmul.f32 %v3655_v58, %v1234_v41  ;;  %v1510_v58 = vld [vmem:[#allocation5 + $0xb8] sm:$0xff] }
 0xd58   :  { %v3657_v63 = vpop.eup %3656 }
 0xd59   :  { %v1249_v1 = vmul.f32 %v3657_v63, %v1233_v45  ;;  %v1256_v3 = vmul.f32 %v3109_v60, %v1250_v62 }
 0xd5b   :  { %v1255_v5 = vmul.f32 %v3109_v60, %v1249_v1  ;;  %v1262_v8 = vadd.f32 %v3110_v4, %v1256_v3  ;;  %v1509_v60 = vld [vmem:[#allocation5 + $0xb0] sm:$0xff] }
 0xd5d   :  { %v3984_v7 = vadd.f32 %v3110_v4, %v1255_v5 }
 0xd5f   :  { %3436 = vmatprep.mubr.msk.f32.mxu1 %vm152_vm2, %v3984_v7 }
 0xd60   :  { %3437 = vmatmul.mubr.msk.f32.vlgmr.msra.gmra.mxu1 %vm152_vm2, %v1262_v8 }
 0xd61   :  { %3459 = vmatpush3.msra.mxu1 %v1512_v56 }
 0xd62   :  { %3460 = vmatprep.subr.mxu1 %v1511_v57 }
 0xd63   :  { %3461 = vmatpush3.msra.mxu1 %v1511_v57 }
 0xd64   :  { %3462 = vmatprep.subr.mxu1 %v1510_v58 }
 0xd65   :  { %3463 = vmatpush3.msra.mxu1 %v1510_v58 }
 0xd66   :  { %3464 = vmatprep.subr.mxu1 %v1509_v60 }
 0xd67   :  { %3465 = vmatpush3.msra.mxu1 %v1509_v60 }
 0xe20   :  { %v3438_v17 = vpop.f32.mrf.mxu1 }
 0xe21   :  { %v1350_v18 = vadd.f32 %v3438_v17, %v3111_v16 }
 0xe22   :  { %v1344_v19 = vpop.f32.mrf.mxu1 }
 0xe23   :  { %v1356_v20 = vmul.f32 0.044715, %v1350_v18  ;;  %v1345_v21 = vadd.f32 %v3111_v16, %v1344_v19  ;;  %v1354_v42 = vmul.f32 0.5, %v1350_v18  ;;  %v3119_v16 = vld [vmem:[#allocation5 + $0xa8] ss:$0 sm:$0xff] }
 0xe25   :  { %v1358_v22 = vmul.f32 %v1356_v20, %v1350_v18  ;;  %v1355_v23 = vmul.f32 0.044715, %v1345_v21  ;;  %v1353_v33 = vmul.f32 0.5, %v1345_v21 }
 0xe27   :  { %v1360_v24 = vmul.f32 %v1358_v22, %v1350_v18  ;;  %v1357_v25 = vmul.f32 %v1355_v23, %v1345_v21 }
 0xe29   :  { %v1362_v26 = vadd.f32 %v1360_v24, %v1350_v18  ;;  %v1359_v27 = vmul.f32 %v1357_v25, %v1345_v21 }
 0xe2b   :  { %v1364_v28 = vmul.f32 0.7978846, %v1362_v26  ;;  %v1361_v29 = vadd.f32 %v1359_v27, %v1345_v21 }
 0xe2d   :  { %3658 = vtanh.f32 %v1364_v28  ;;  %v1363_v30 = vmul.f32 0.7978846, %v1361_v29 }
 0xe2f   :  { %3660 = vtanh.f32 %v1363_v30 }
 0xe3a   :  { %v3659_v31 = vpop.eup %3658 }
 0xe3b   :  { %v1368_v32 = vadd.f32 1.0, %v3659_v31 }
 0xe3c   :  { %v3661_v44 = vpop.eup %3660 }
 0xe3d   :  { %v1367_v34 = vadd.f32 1.0, %v3661_v44  ;;  %v1370_v36 = vmul.f32 %v1368_v32, %v1354_v42 }
 0xe3f   :  { %v1369_v35 = vmul.f32 %v1367_v34, %v1353_v33 }
 0xe41   :  { %3455 = vmatprep.mubr.msk.f32.mxu0 %vm1384_vm6, %v1369_v35 }
 0xe42   :  { %3456 = vmatmul.mubr.msk.f32.vlgmr.msra.gmra.mxu0 %vm1384_vm6, %v1370_v36 }
 0xf02   :  { %v3457_v38 = vpop.f32.mrf.mxu0 }
 0xf03   :  { %v1463_v39 = vadd.f32 %v3457_v38, %v3114_v37 }
 0xf04   :  { %v1457_v40 = vpop.f32.mrf.mxu0 }
 0xf05   :  { %v1458_v41 = vadd.f32 %v3114_v37, %v1457_v40  ;;  %v1467_v43 = vadd.f32 %v1463_v39, %v1262_v8  ;;  %v3117_v8 = vld [vmem:[#allocation5 + $0x6] ss:$0 sm:$0xff] }
 0xf07   :  { %v1473_v45 = vsel %vm152_vm2, %v1467_v43, 0.0  ;;  %v1466_v46 = vadd.f32 %v1458_v41, %v3984_v7 }
 0xf08   :  { %1474 = vadd.xlane.f32.xlu1 %v1473_v45 }
 0xf09   :  { %v1470_v47 = vsel %vm152_vm2, %v1466_v46, 0.0 }
 0xf0a   :  { %1471 = vadd.xlane.f32.xlu0 %v1470_v47 }
 0xf91   :  { %v1475_v48 = vpop.xlane.xlu1 %1474 }
 0xf92   :  { %v1477_v61 = vmul.f32 0.03125, %v1475_v48 }
 0xf93   :  { %v1472_v49 = vpop.xlane.xlu0 %1471 }
 0xf94   :  { %v1479_v59 = vsub.f32 %v1467_v43, %v1477_v61  ;;  %v1476_v50 = vmul.f32 0.03125, %v1472_v49 }
 0xf96   :  { %v1478_v51 = vsub.f32 %v1466_v46, %v1476_v50  ;;  %v1481_v52 = vmul.f32 %v1479_v59, %v1479_v59 }
 0xf98   :  { %v1485_v53 = vsel %vm152_vm2, %v1481_v52, 0.0  ;;  %v1480_v54 = vmul.f32 %v1478_v51, %v1478_v51 }
 0xf99   :  { %1486 = vadd.xlane.f32.xlu1 %v1485_v53 }
 0xf9a   :  { %v1482_v55 = vsel %vm152_vm2, %v1480_v54, 0.0 }
 0xf9b   :  { %1483 = vadd.xlane.f32.xlu0 %v1482_v55 }
0x1022   :  { %v1487_v62 = vpop.xlane.xlu1 %1486 }
0x1023   :  { %v1489_v63 = vmul.f32 0.03125, %v1487_v62 }
0x1024   :  { %v1484_v1 = vpop.xlane.xlu0 %1483 }
0x1025   :  { %v1491_v3 = vadd.f32 1e-12, %v1489_v63  ;;  %v1488_v4 = vmul.f32 0.03125, %v1484_v1 }
0x1027   :  { %3662 = vrsqrt.f32 %v1491_v3  ;;  %v1490_v5 = vadd.f32 1e-12, %v1488_v4 }
0x1029   :  { %3664 = vrsqrt.f32 %v1490_v5 }
0x1034   :  { %v3663_v7 = vpop.eup %3662 }
0x1035   :  { %v1495_v10 = vmul.f32 %v3663_v7, %v1479_v59 }
0x1036   :  { %v3665_v2 = vpop.eup %3664 }
0x1037   :  { %v1494_v11 = vmul.f32 %v3665_v2, %v1478_v51  ;;  %v1501_v0 = vmul.f32 %v3117_v8, %v1495_v10 }
0x1039   :  { %v1500_v13 = vmul.f32 %v3117_v8, %v1494_v11  ;;  %v3998_v15 = vadd.f32 %v3118_v12, %v1501_v0 }
0x103b   :  { %v3996_v14 = vadd.f32 %v3118_v12, %v1500_v13 }
0x103d   :  { %3466 = vmatprep.mubr.msk.f32.mxu1 %vm152_vm2, %v3996_v14 }
0x103e   :  { %3467 = vmatmul.mubr.msk.f32.vlgmr.msra.gmra.mxu1 %vm152_vm2, %v3998_v15 }
0x10fe   :  { %v3468_v17 = vpop.f32.mrf.mxu1 }
0x10ff   :  { %v4004_v18 = vadd.f32 %v3468_v17, %v3119_v16 }
0x1100   :  { %v1590_v19 = vpop.f32.mrf.mxu1 }
0x1101   :  { %v4006_v20 = vadd.f32 %v3119_v16, %v1590_v19  ;;  %1603 = vrot.lane.b32.xlu0 %v4004_v18, %s3786_s0 }
0x1103   :  { %1601 = vrot.lane.b32.xlu1 %v4006_v20, %s3786_s0  ;;  %3473 = vmatprep.mubr.msk.f32.mxu1 %vm290_vm3, %v4006_v20 }
0x1105   :  { %1805 = vrot.lane.b32.xlu0 %v4006_v20, %s3789_s28 }
0x1107   :  { %1807 = vrot.lane.b32.xlu1 %v4004_v18, %s3789_s28 }
0x1109   :  { %1803 = vrot.lane.b32.xlu0 %v4004_v18, %s3788_s27 }
0x110b   :  { %1801 = vrot.lane.b32.xlu1 %v4006_v20, %s3788_s27 }
0x1173   :  { %v1604_v21 = vpop.permute.xlu0 %1603 }
0x1174   :  { %3469 = vmatprep.subr.msk.mxu1 %vm290_vm3, %v1604_v21 }
0x1175   :  { %3470 = vmatpush3.xpose.msk.msra.mxu1 %vm290_vm3, %v1604_v21  ;;  %v1602_v22 = vpop.permute.xlu1 %1601 }
0x1176   :  { %3471 = vmatprep.subr.msk.mxu1 %vm290_vm3, %v1602_v22 }
0x1177   :  { %v1806_v24 = vpop.permute.xlu0 %1805 }
0x1179   :  { %3472 = vmatpush3.xpose.msk.msra.mxu1 %vm290_vm3, %v1602_v22  ;;  %v1808_v23 = vpop.permute.xlu1 %1807 }
0x117a   :  { %3483 = vmatprep.subr.msk.mxu1 %vm290_vm3, %v1808_v23 }
0x117b   :  { %v1804_v26 = vpop.permute.xlu0 %1803 }
0x117c   :  { %3474 = vmatmul.mubr.msk.f32.vlgmr.msra.gmra.mxu1 %vm290_vm3, %v4004_v18 }
0x117d   :  { %v1802_v25 = vpop.permute.xlu1 %1801  ;;  %3484 = vmatpush3.xpose.msk.msra.mxu1 %vm290_vm3, %v1808_v23 }
0x117e   :  { %3485 = vmatprep.subr.msk.mxu1 %vm290_vm3, %v1806_v24  ;;  %3487 = vmatprep.mubr.msk.f32.mxu1 %vm290_vm3, %v1802_v25 }
0x1181   :  { %3486 = vmatpush3.xpose.msk.msra.mxu1 %vm290_vm3, %v1806_v24 }
0x1184   :  { %3488 = vmatmul.mubr.msk.f32.vlgmr.msra.gmra.mxu1 %vm290_vm3, %v1804_v26 }
0x123c   :  { %v3475_v27 = vpop.f32.mrf.mxu1 }
0x123d   :  { %v1689_v28 = vmul.f32 0.35355338, %v3475_v27 }
0x123e   :  { %v1679_v29 = vpop.f32.mrf.mxu1 }
0x123f   :  { %v1688_v30 = vmul.f32 0.35355338, %v1679_v29  ;;  %v1691_v31 = vadd.f32 %v1689_v28, %v3864_v6 }
0x1241   :  { %v1695_v44 = vsel %vm378_vm4, %v1691_v31, -inf  ;;  %v1690_v32 = vadd.f32 %v1688_v30, %v3866_v9 }
0x1242   :  { %1696 = vmax.xlane.f32.xlu0 %v1695_v44 }
0x1243   :  { %v1692_v33 = vsel %vm378_vm4, %v1690_v32, -inf }
0x1244   :  { %v3489_v34 = vpop.f32.mrf.mxu1  ;;  %1693 = vmax.xlane.f32.xlu1 %v1692_v33  ;;  %v3713_v33 = vld [vmem:[#allocation2 + $0x18] sm:$0xff] }
0x1245   :  { %v1893_v42 = vmul.f32 0.35355338, %v3489_v34 }
0x1246   :  { %v1883_v35 = vpop.f32.mrf.mxu1 }
0x1247   :  { %v1892_v36 = vmul.f32 0.35355338, %v1883_v35  ;;  %v1895_v37 = vadd.f32 %v1893_v42, %v3864_v6 }
0x1249   :  { %v1899_v38 = vsel %vm378_vm4, %v1895_v37, -inf  ;;  %v1894_v39 = vadd.f32 %v1892_v36, %v3866_v9 }
0x124a   :  { %1900 = vmax.xlane.f32.xlu1 %v1899_v38 }
0x124b   :  { %v1896_v40 = vsel %vm378_vm4, %v1894_v39, -inf }
0x124c   :  { %1897 = vmax.xlane.f32.xlu0 %v1896_v40 }
0x125b   :  { %1714 = vrot.lane.b32.xlu1 %v4006_v20, %s3787_s2 }
0x125f   :  { %1920 = vrot.lane.b32.xlu1 %v4004_v18, %s3792_s4 }
0x1262   :  { %1716 = vrot.lane.b32.xlu0 %v4004_v18, %s3787_s2 }
0x12cb   :  { %v1697_v41 = vpop.xlane.xlu0 %1696 }
0x12cc   :  { %v1699_v43 = vsub.f32 %v1691_v31, %v1697_v41  ;;  %v3712_v31 = vld [vmem:[#allocation2 + $0x20] sm:$0xff] }
0x12cd   :  { %v1694_v6 = vpop.xlane.xlu1 %1693 }
0x12ce   :  { %v1702_v45 = vmul.f32 1.442695, %v1699_v43  ;;  %v1698_v46 = vsub.f32 %v1690_v32, %v1694_v6 }
0x12d0   :  { %3666 = vpow2.f32 %v1702_v45  ;;  %v1700_v9 = vmul.f32 1.442695, %v1698_v46 }
0x12d2   :  { %3668 = vpow2.f32 %v1700_v9 }
0x12d3   :  { %v1901_v47 = vpop.xlane.xlu1 %1900 }
0x12d4   :  { %v1903_v48 = vsub.f32 %v1895_v37, %v1901_v47 }
0x12d5   :  { %v1898_v61 = vpop.xlane.xlu0 %1897 }
0x12d6   :  { %v1906_v49 = vmul.f32 1.442695, %v1903_v48  ;;  %v1902_v59 = vsub.f32 %v1894_v39, %v1898_v61 }
0x12d7   :  { %v1715_v50 = vpop.permute.xlu1 %1714 }
0x12d8   :  { %3670 = vpow2.f32 %v1906_v49  ;;  %v1904_v51 = vmul.f32 1.442695, %v1902_v59 }
0x12d9   :  { %v1717_v52 = vpop.permute.xlu0 %1716 }
0x12da   :  { %3672 = vpow2.f32 %v1904_v51  ;;  %3476 = vmatprep.subr.mxu0 %v1717_v52 }
0x12db   :  { %3477 = vmatpush3.msra.mxu0 %v1717_v52  ;;  %v1921_v54 = vpop.permute.xlu1 %1920 }
0x12dc   :  { %3478 = vmatprep.subr.mxu0 %v1715_v50 }
0x12dd   :  { %v3667_v53 = vpop.eup %3666  ;;  %3479 = vmatpush3.msra.mxu0 %v1715_v50 }
0x12de   :  { %3490 = vmatprep.subr.mxu0 %v1921_v54  ;;  %v1707_v55 = vsel %vm378_vm4, %v3667_v53, 0.0 }
0x12df   :  { %v3669_v56 = vpop.eup %3668  ;;  %1708 = vadd.xlane.f32.xlu1 %v1707_v55 }
0x12e0   :  { %v1704_v57 = vsel %vm378_vm4, %v3669_v56, 0.0 }
0x12e1   :  { %1705 = vadd.xlane.f32.xlu0 %v1704_v57 }
0x12e5   :  { %v3671_v58 = vpop.eup %3670 }
0x12e6   :  { %v1911_v60 = vsel %vm378_vm4, %v3671_v58, 0.0 }
0x12e7   :  { %v3673_v62 = vpop.eup %3672  ;;  %1912 = vadd.xlane.f32.xlu1 %v1911_v60 }
0x12e8   :  { %v1908_v63 = vsel %vm378_vm4, %v3673_v62, 0.0 }
0x12e9   :  { %1909 = vadd.xlane.f32.xlu0 %v1908_v63 }
0x12f8   :  { %2011 = vrot.lane.b32.xlu1 %v4004_v18, %s3791_s30 }
0x12fc   :  { %2005 = vrot.lane.b32.xlu1 %v4006_v20, %s3790_s29 }
0x12ff   :  { %1918 = vrot.lane.b32.xlu0 %v4006_v20, %s3792_s4 }
0x1303   :  { %2009 = vrot.lane.b32.xlu0 %v4006_v20, %s3791_s30 }
0x1307   :  { %2007 = vrot.lane.b32.xlu0 %v4004_v18, %s3790_s29 }
0x1368   :  { %v1709_v1 = vpop.xlane.xlu1 %1708 }
0x1369   :  { %3674 = vrcp.f32 %v1709_v1 }
0x136a   :  { %v1706_v3 = vpop.xlane.xlu0 %1705 }
0x136b   :  { %3676 = vrcp.f32 %v1706_v3 }
0x1370   :  { %v1913_v4 = vpop.xlane.xlu1 %1912 }
0x1371   :  { %3678 = vrcp.f32 %v1913_v4 }
0x1372   :  { %v1910_v5 = vpop.xlane.xlu0 %1909 }
0x1373   :  { %3680 = vrcp.f32 %v1910_v5 }
0x1374   :  { %v2012_v0 = vpop.permute.xlu1 %2011 }
0x1376   :  { %v3675_v7 = vpop.eup %3674  ;;  %v1919_v11 = vpop.permute.xlu0 %1918 }
0x1377   :  { %v1713_v2 = vmul.f32 %v3675_v7, %v3667_v53 }
0x1378   :  { %v3677_v8 = vpop.eup %3676  ;;  %v2006_v19 = vpop.permute.xlu1 %2005 }
0x1379   :  { %v1712_v10 = vmul.f32 %v3677_v8, %v3669_v56 }
0x137a   :  { %v2010_v21 = vpop.permute.xlu0 %2009 }
0x137b   :  { %3480 = vmatprep.mubr.msk.f32.mxu0 %vm378_vm4, %v1712_v10 }
0x137c   :  { %3481 = vmatmul.mubr.msk.f32.vlgmr.msra.gmra.mxu0 %vm378_vm4, %v1713_v2 }
0x137d   :  { %3491 = vmatpush3.msra.mxu0 %v1921_v54 }
0x137e   :  { %3492 = vmatprep.subr.mxu0 %v1919_v11  ;;  %v3679_v12 = vpop.eup %3678  ;;  %v2008_v22 = vpop.permute.xlu0 %2007 }
0x137f   :  { %3493 = vmatpush3.msra.mxu0 %v1919_v11  ;;  %v1917_v17 = vmul.f32 %v3679_v12, %v3671_v58 }
0x1380   :  { %v3681_v13 = vpop.eup %3680  ;;  %3497 = vmatprep.subr.msk.mxu0 %vm290_vm3, %v2012_v0 }
0x1381   :  { %v1916_v16 = vmul.f32 %v3681_v13, %v3673_v62 }
0x1383   :  { %3494 = vmatprep.mubr.msk.f32.mxu0 %vm378_vm4, %v1916_v16 }
0x1384   :  { %3495 = vmatmul.mubr.msk.f32.vlgmr.msra.gmra.mxu0 %vm378_vm4, %v1917_v17 }
0x1385   :  { %3498 = vmatpush3.xpose.msk.msra.mxu0 %vm290_vm3, %v2012_v0  ;;  %3501 = vmatprep.mubr.msk.f32.mxu0 %vm290_vm3, %v2006_v19 }
0x1386   :  { %3499 = vmatprep.subr.msk.mxu0 %vm290_vm3, %v2010_v21 }
0x1389   :  { %3500 = vmatpush3.xpose.msk.msra.mxu0 %vm290_vm3, %v2010_v21 }
0x138c   :  { %3502 = vmatmul.mubr.msk.f32.vlgmr.msra.gmra.mxu0 %vm290_vm3, %v2008_v22 }
0x143c   :  { %v4072_v23 = vpop.f32.mrf.mxu0 }
0x143e   :  { %v4074_v24 = vpop.f32.mrf.mxu0 }
0x1444   :  { %v4076_v25 = vpop.f32.mrf.mxu0 }
0x1446   :  { %v4078_v26 = vpop.f32.mrf.mxu0 }
0x144c   :  { %v3503_v27 = vpop.f32.mrf.mxu0 }
0x144d   :  { %v2097_v28 = vmul.f32 0.35355338, %v3503_v27 }
0x144e   :  { %v2087_v29 = vpop.f32.mrf.mxu0 }
0x144f   :  { %v2096_v30 = vmul.f32 0.35355338, %v2087_v29  ;;  %v2099_v44 = vadd.f32 %v3712_v31, %v2097_v28  ;;  %v2445_v28 = vld [vmem:[#allocation5 + $0xe0] sm:$0xff]  ;;  %v2444_v29 = vld [vmem:[#allocation5 + $0xd8] sm:$0xff] }
0x1451   :  { %v2103_v32 = vsel %vm378_vm4, %v2099_v44, -inf  ;;  %v2098_v34 = vadd.f32 %v3713_v33, %v2096_v30  ;;  %v2443_v30 = vld [vmem:[#allocation5 + $0xd0] sm:$0xff] }
0x1452   :  { %2104 = vmax.xlane.f32.xlu0 %v2103_v32 }
0x1453   :  { %v2100_v42 = vsel %vm378_vm4, %v2098_v34, -inf }
0x1454   :  { %2101 = vmax.xlane.f32.xlu1 %v2100_v42 }
0x14db   :  { %v2105_v35 = vpop.xlane.xlu0 %2104 }
0x14dc   :  { %v2107_v36 = vsub.f32 %v2099_v44, %v2105_v35 }
0x14dd   :  { %v2102_v37 = vpop.xlane.xlu1 %2101 }
0x14de   :  { %v2110_v38 = vmul.f32 1.442695, %v2107_v36  ;;  %v2106_v39 = vsub.f32 %v2098_v34, %v2102_v37 }
0x14e0   :  { %3682 = vpow2.f32 %v2110_v38  ;;  %v2108_v40 = vmul.f32 1.442695, %v2106_v39 }
0x14e2   :  { %3684 = vpow2.f32 %v2108_v40 }
0x14ed   :  { %v3683_v41 = vpop.eup %3682 }
0x14ee   :  { %v2115_v43 = vsel %vm378_vm4, %v3683_v41, 0.0 }
0x14ef   :  { %v3685_v6 = vpop.eup %3684  ;;  %2116 = vadd.xlane.f32.xlu1 %v2115_v43 }
0x14f0   :  { %v2112_v45 = vsel %vm378_vm4, %v3685_v6, 0.0 }
0x14f1   :  { %2113 = vadd.xlane.f32.xlu0 %v2112_v45 }
0x1500   :  { %2122 = vrot.lane.b32.xlu1 %v4006_v20, %s3793_s5 }
0x1504   :  { %2215 = vrot.lane.b32.xlu1 %v4004_v18, %s3794_s6 }
0x1507   :  { %2124 = vrot.lane.b32.xlu0 %v4004_v18, %s3793_s5 }
0x1508   :  { %2209 = vrot.lane.b32.xlu1 %v4006_v20, %s3795_s7 }
0x150b   :  { %2213 = vrot.lane.b32.xlu0 %v4006_v20, %s3794_s6 }
0x150f   :  { %2211 = vrot.lane.b32.xlu0 %v4004_v18, %s3795_s7 }
0x1578   :  { %v2117_v46 = vpop.xlane.xlu1 %2116 }
0x1579   :  { %3686 = vrcp.f32 %v2117_v46 }
0x157a   :  { %v2114_v9 = vpop.xlane.xlu0 %2113 }
0x157b   :  { %3688 = vrcp.f32 %v2114_v9 }
0x157c   :  { %v2123_v47 = vpop.permute.xlu1 %2122 }
0x157e   :  { %v2125_v48 = vpop.permute.xlu0 %2124 }
0x157f   :  { %3504 = vmatprep.subr.mxu1 %v2125_v48 }
0x1580   :  { %3505 = vmatpush3.msra.mxu1 %v2125_v48  ;;  %v2216_v61 = vpop.permute.xlu1 %2215 }
0x1581   :  { %3506 = vmatprep.subr.mxu1 %v2123_v47 }
0x1582   :  { %3507 = vmatpush3.msra.mxu1 %v2123_v47  ;;  %v2214_v53 = vpop.permute.xlu0 %2213 }
0x1583   :  { %3511 = vmatprep.subr.msk.mxu1 %vm290_vm3, %v2216_v61 }
0x1584   :  { %v2210_v52 = vpop.permute.xlu1 %2209 }
0x1586   :  { %v3687_v49 = vpop.eup %3686  ;;  %v2212_v54 = vpop.permute.xlu0 %2211 }
0x1587   :  { %v2121_v51 = vmul.f32 %v3687_v49, %v3683_v41 }
0x1588   :  { %v3689_v59 = vpop.eup %3688 }
0x1589   :  { %v2120_v50 = vmul.f32 %v3689_v59, %v3685_v6  ;;  %v3146_v6 = vld [vmem:[#allocation5 + $0xa9] ss:$0 sm:$0xff] }
0x158b   :  { %3508 = vmatprep.mubr.msk.f32.mxu1 %vm378_vm4, %v2120_v50 }
0x158c   :  { %3509 = vmatmul.mubr.msk.f32.vlgmr.msra.gmra.mxu1 %vm378_vm4, %v2121_v51 }
0x158d   :  { %3512 = vmatpush3.xpose.msk.msra.mxu1 %vm290_vm3, %v2216_v61  ;;  %3515 = vmatprep.mubr.msk.f32.mxu1 %vm290_vm3, %v2210_v52 }
0x158e   :  { %3513 = vmatprep.subr.msk.mxu1 %vm290_vm3, %v2214_v53 }
0x1591   :  { %3514 = vmatpush3.xpose.msk.msra.mxu1 %vm290_vm3, %v2214_v53 }
0x1594   :  { %3516 = vmatmul.mubr.msk.f32.vlgmr.msra.gmra.mxu1 %vm290_vm3, %v2212_v54 }
0x164c   :  { %v3510_v55 = vpop.f32.mrf.mxu1 }
0x164e   :  { %v2200_v56 = vpop.f32.mrf.mxu1 }
0x1654   :  { %v3517_v57 = vpop.f32.mrf.mxu1 }
0x1655   :  { %v2301_v58 = vmul.f32 0.35355338, %v3517_v57  ;;  %v2577_v57 = vld [vmem:[#allocation5 + $0x100] sm:$0xff] }
0x1656   :  { %v2291_v60 = vpop.f32.mrf.mxu1 }
0x1657   :  { %v2300_v62 = vmul.f32 0.35355338, %v2291_v60  ;;  %v2303_v63 = vadd.f32 %v3712_v31, %v2301_v58  ;;  %v2576_v58 = vld [vmem:[#allocation5 + $0xf8] sm:$0xff]  ;;  %v2575_v60 = vld [vmem:[#allocation5 + $0xf0] sm:$0xff] }
0x1659   :  { %v2307_v1 = vsel %vm378_vm4, %v2303_v63, -inf  ;;  %v2302_v3 = vadd.f32 %v3713_v33, %v2300_v62 }
0x165a   :  { %2308 = vmax.xlane.f32.xlu0 %v2307_v1 }
0x165b   :  { %v2304_v4 = vsel %vm378_vm4, %v2302_v3, -inf }
0x165c   :  { %2305 = vmax.xlane.f32.xlu1 %v2304_v4 }
0x16e3   :  { %v2309_v5 = vpop.xlane.xlu0 %2308 }
0x16e4   :  { %v2311_v7 = vsub.f32 %v2303_v63, %v2309_v5 }
0x16e5   :  { %v2306_v8 = vpop.xlane.xlu1 %2305 }
0x16e6   :  { %v2314_v10 = vmul.f32 1.442695, %v2311_v7  ;;  %v2310_v2 = vsub.f32 %v2302_v3, %v2306_v8  ;;  %v3149_v8 = vld [vmem:[#allocation5 + $0xaa] ss:$0 sm:$0xff] }
0x16e8   :  { %3690 = vpow2.f32 %v2314_v10  ;;  %v2312_v11 = vmul.f32 1.442695, %v2310_v2 }
0x16ea   :  { %3692 = vpow2.f32 %v2312_v11 }
0x16f5   :  { %v3691_v0 = vpop.eup %3690 }
0x16f6   :  { %v2319_v12 = vsel %vm378_vm4, %v3691_v0, 0.0 }
0x16f7   :  { %v3693_v13 = vpop.eup %3692  ;;  %2320 = vadd.xlane.f32.xlu1 %v2319_v12  ;;  %v3150_v12 = vld [vmem:[#allocation5 + $0xab] ss:$0 sm:$0xff] }
0x16f8   :  { %v2316_v16 = vsel %vm378_vm4, %v3693_v13, 0.0 }
0x16f9   :  { %2317 = vadd.xlane.f32.xlu0 %v2316_v16 }
0x1708   :  { %2326 = vrot.lane.b32.xlu1 %v4006_v20, %s3796_s8 }
0x170c   :  { %2415 = vrot.lane.b32.xlu1 %v4078_v26, %s3782_s16 }
0x170f   :  { %2328 = vrot.lane.b32.xlu0 %v4004_v18, %s3796_s8 }
0x1710   :  { %2423 = vrot.lane.b32.xlu1 %v2200_v56, %s3797_s9 }
0x1713   :  { %2417 = vrot.lane.b32.xlu0 %v4076_v25, %s3782_s16  ;;  %v2446_v25 = vld [vmem:[#allocation5 + $0xe8] sm:$0xff] }
0x1717   :  { %2425 = vrot.lane.b32.xlu0 %v3510_v55, %s3797_s9 }
0x1780   :  { %v2321_v17 = vpop.xlane.xlu1 %2320 }
0x1781   :  { %3694 = vrcp.f32 %v2321_v17 }
0x1782   :  { %v2318_v19 = vpop.xlane.xlu0 %2317 }
0x1783   :  { %3696 = vrcp.f32 %v2318_v19  ;;  %v2690_v19 = vld [vmem:[#allocation5 + $0x148] sm:$0xff] }
0x1784   :  { %v2327_v20 = vpop.permute.xlu1 %2326 }
0x1786   :  { %v2329_v21 = vpop.permute.xlu0 %2328 }
0x1787   :  { %3518 = vmatprep.subr.mxu0 %v2329_v21 }
0x1788   :  { %3519 = vmatpush3.msra.mxu0 %v2329_v21  ;;  %v2416_v33 = vpop.permute.xlu1 %2415  ;;  %v2689_v21 = vld [vmem:[#allocation5 + $0x140] sm:$0xff] }
0x1789   :  { %3520 = vmatprep.subr.mxu0 %v2327_v20  ;;  %v2437_v35 = vsel %vm290_vm3, %v4074_v24, %v2416_v33 }
0x178a   :  { %3521 = vmatpush3.msra.mxu0 %v2327_v20  ;;  %v2418_v32 = vpop.permute.xlu0 %2417  ;;  %v2688_v20 = vld [vmem:[#allocation5 + $0x138] sm:$0xff] }
0x178b   :  { %3525 = vmatprep.subr.mxu0 %v2446_v25  ;;  %v2438_v37 = vsel %vm290_vm3, %v4072_v23, %v2418_v32 }
0x178c   :  { %v2424_v42 = vpop.permute.xlu1 %2423 }
0x178d   :  { %v2439_v38 = vsel %vm378_vm4, %v2437_v35, %v2424_v42 }
0x178e   :  { %v3695_v22 = vpop.eup %3694  ;;  %v2426_v34 = vpop.permute.xlu0 %2425 }
0x178f   :  { %v2325_v27 = vmul.f32 %v3695_v22, %v3691_v0  ;;  %v2440_v40 = vsel %vm378_vm4, %v2438_v37, %v2426_v34  ;;  %v2687_v22 = vld [vmem:[#allocation5 + $0x130] sm:$0xff] }
0x1790   :  { %v3697_v26 = vpop.eup %3696 }
0x1791   :  { %v2324_v18 = vmul.f32 %v3697_v26, %v3693_v13  ;;  %v2686_v26 = vld [vmem:[#allocation5 + $0x128] sm:$0xff] }
0x1793   :  { %3522 = vmatprep.mubr.msk.f32.mxu0 %vm378_vm4, %v2324_v18  ;;  %v2685_v18 = vld [vmem:[#allocation5 + $0x120] sm:$0xff] }
0x1794   :  { %3523 = vmatmul.mubr.msk.f32.vlgmr.msra.gmra.mxu0 %vm378_vm4, %v2325_v27  ;;  %v2684_v27 = vld [vmem:[#allocation5 + $0x118] sm:$0xff] }
0x1795   :  { %3526 = vmatpush3.msra.mxu0 %v2446_v25  ;;  %v2683_v25 = vld [vmem:[#allocation5 + $0x110] sm:$0xff] }
0x1796   :  { %3527 = vmatprep.subr.mxu0 %v2445_v28 }
0x1797   :  { %3528 = vmatpush3.msra.mxu0 %v2445_v28  ;;  %v3151_v28 = vld [vmem:[#allocation5 + $0xac] ss:$0 sm:$0xff] }
0x1798   :  { %3529 = vmatprep.subr.mxu0 %v2444_v29 }
0x1799   :  { %3530 = vmatpush3.msra.mxu0 %v2444_v29 }
0x179a   :  { %3531 = vmatprep.subr.mxu0 %v2443_v30 }
0x179b   :  { %3532 = vmatpush3.msra.mxu0 %v2443_v30 }
0x179c   :  { %3547 = vmatprep.subr.mxu0 %v2690_v19 }
0x1854   :  { %v3524_v31 = vpop.f32.mrf.mxu0 }
0x1855   :  { %2433 = vrot.lane.b32.xlu0 %v3524_v31, %s3798_s10 }
0x1856   :  { %v2404_v44 = vpop.f32.mrf.mxu0 }
0x1857   :  { %2431 = vrot.lane.b32.xlu1 %v2404_v44, %s3798_s10 }
0x18c7   :  { %v2434_v36 = vpop.permute.xlu0 %2433 }
0x18c8   :  { %v2442_v43 = vsel %vm1128_vm5, %v2440_v40, %v2434_v36 }
0x18c9   :  { %v2432_v39 = vpop.permute.xlu1 %2431 }
0x18ca   :  { %v2441_v41 = vsel %vm1128_vm5, %v2439_v38, %v2432_v39 }
0x18cb   :  { %3533 = vmatprep.mubr.msk.f32.mxu0 %vm152_vm2, %v2441_v41 }
0x18cc   :  { %3534 = vmatmul.mubr.msk.f32.vlgmr.msra.gmra.mxu0 %vm152_vm2, %v2442_v43 }
0x18cd   :  { %3548 = vmatpush3.msra.mxu0 %v2690_v19 }
0x18ce   :  { %3549 = vmatprep.subr.mxu0 %v2689_v21 }
0x18cf   :  { %3550 = vmatpush3.msra.mxu0 %v2689_v21 }
0x18d0   :  { %3551 = vmatprep.subr.mxu0 %v2688_v20 }
0x18d1   :  { %3552 = vmatpush3.msra.mxu0 %v2688_v20 }
0x18d2   :  { %3553 = vmatprep.subr.mxu0 %v2687_v22 }
0x18d3   :  { %3554 = vmatpush3.msra.mxu0 %v2687_v22  ;;  %v2819_v22 = vld [vmem:[#allocation2 + $0x28] sm:$0xff] }
0x18d4   :  { %3555 = vmatprep.subr.mxu0 %v2686_v26 }
0x18d5   :  { %3556 = vmatpush3.msra.mxu0 %v2686_v26  ;;  %v2896_v26 = vld [vmem:[#allocation2 + $0x48] sm:$0xff] }
0x18d6   :  { %3557 = vmatprep.subr.mxu0 %v2685_v18 }
0x18d7   :  { %3558 = vmatpush3.msra.mxu0 %v2685_v18  ;;  %v2895_v18 = vld [vmem:[#allocation2 + $0x40] sm:$0xff] }
0x18d8   :  { %3559 = vmatprep.subr.mxu0 %v2684_v27 }
0x18d9   :  { %3560 = vmatpush3.msra.mxu0 %v2684_v27  ;;  %v2894_v27 = vld [vmem:[#allocation2 + $0x38] sm:$0xff] }
0x18da   :  { %3561 = vmatprep.subr.mxu0 %v2683_v25 }
0x18db   :  { %3562 = vmatpush3.msra.mxu0 %v2683_v25  ;;  %v2893_v25 = vld [vmem:[#allocation2 + $0x30] sm:$0xff] }
0x198c   :  { %v3535_v45 = vpop.f32.mrf.mxu0 }
0x198d   :  { %v2530_v24 = vadd.f32 %v3535_v45, %v3146_v6 }
0x198e   :  { %v2524_v46 = vpop.f32.mrf.mxu0 }
0x198f   :  { %v2534_v9 = vadd.f32 %v2530_v24, %v3998_v15  ;;  %v2525_v23 = vadd.f32 %v3146_v6, %v2524_v46 }
0x1991   :  { %v2533_v47 = vadd.f32 %v2525_v23, %v3996_v14  ;;  %v2540_v48 = vsel %vm152_vm2, %v2534_v9, 0.0  ;;  %v2578_v14 = vld [vmem:[#allocation5 + $0x108] sm:$0xff] }
0x1992   :  { %2541 = vadd.xlane.f32.xlu0 %v2540_v48  ;;  %3536 = vmatprep.subr.mxu1 %v2578_v14 }
0x1993   :  { %v2537_v61 = vsel %vm152_vm2, %v2533_v47, 0.0  ;;  %3537 = vmatpush3.msra.mxu1 %v2578_v14 }
0x1994   :  { %2538 = vadd.xlane.f32.xlu1 %v2537_v61  ;;  %3538 = vmatprep.subr.mxu1 %v2577_v57 }
0x1995   :  { %3539 = vmatpush3.msra.mxu1 %v2577_v57 }
0x1996   :  { %3540 = vmatprep.subr.mxu1 %v2576_v58 }
0x1997   :  { %3541 = vmatpush3.msra.mxu1 %v2576_v58 }
0x1998   :  { %3542 = vmatprep.subr.mxu1 %v2575_v60 }
0x1999   :  { %3543 = vmatpush3.msra.mxu1 %v2575_v60 }
0x1a1b   :  { %v2542_v49 = vpop.xlane.xlu0 %2541 }
0x1a1c   :  { %v2544_v59 = vmul.f32 0.03125, %v2542_v49 }
0x1a1d   :  { %v2539_v50 = vpop.xlane.xlu1 %2538 }
0x1a1e   :  { %v2546_v51 = vsub.f32 %v2534_v9, %v2544_v59  ;;  %v2543_v52 = vmul.f32 0.03125, %v2539_v50 }
0x1a20   :  { %v2545_v53 = vsub.f32 %v2533_v47, %v2543_v52  ;;  %v2548_v54 = vmul.f32 %v2546_v51, %v2546_v51  ;;  %v3154_v47 = vld [vmem:[#allocation5 + $0xad] ss:$0 sm:$0xff] }
0x1a22   :  { %v2552_v55 = vsel %vm152_vm2, %v2548_v54, 0.0  ;;  %v2547_v56 = vmul.f32 %v2545_v53, %v2545_v53 }
0x1a23   :  { %2553 = vadd.xlane.f32.xlu1 %v2552_v55 }
0x1a24   :  { %v2549_v15 = vsel %vm152_vm2, %v2547_v56, 0.0 }
0x1a25   :  { %2550 = vadd.xlane.f32.xlu0 %v2549_v15 }
0x1aac   :  { %v2554_v62 = vpop.xlane.xlu1 %2553 }
0x1aad   :  { %v2556_v63 = vmul.f32 0.03125, %v2554_v62 }
0x1aae   :  { %v2551_v1 = vpop.xlane.xlu0 %2550 }
0x1aaf   :  { %v2558_v3 = vadd.f32 1e-12, %v2556_v63  ;;  %v2555_v4 = vmul.f32 0.03125, %v2551_v1  ;;  %v3799_v1 = vmov 0.0  }
0x1ab0   :  { %3566 = vmatprep.subr.mxu1 %v3799_v1 }
0x1ab1   :  { %3698 = vrsqrt.f32 %v2558_v3  ;;  %v2557_v5 = vadd.f32 1e-12, %v2555_v4 }
0x1ab3   :  { %3700 = vrsqrt.f32 %v2557_v5 }
0x1abe   :  { %v3699_v7 = vpop.eup %3698 }
0x1abf   :  { %v2562_v10 = vmul.f32 %v3699_v7, %v2546_v51 }
0x1ac0   :  { %v3701_v2 = vpop.eup %3700 }
0x1ac1   :  { %v2561_v11 = vmul.f32 %v3701_v2, %v2545_v53  ;;  %v2568_v0 = vmul.f32 %v3149_v8, %v2562_v10 }
0x1ac3   :  { %v2567_v13 = vmul.f32 %v3149_v8, %v2561_v11  ;;  %v2574_v17 = vadd.f32 %v3150_v12, %v2568_v0  ;;  %v3157_v11 = vld [vmem:[#allocation5 + $0xae] ss:$0 sm:$0xff] }
0x1ac5   :  { %v2573_v16 = vadd.f32 %v3150_v12, %v2567_v13  ;;  %v3158_v13 = vld [vmem:[#allocation5 + $0xaf] ss:$0 sm:$0xff] }
0x1ac7   :  { %3544 = vmatprep.mubr.msk.f32.mxu1 %vm152_vm2, %v2573_v16 }
0x1ac8   :  { %3545 = vmatmul.mubr.msk.f32.vlgmr.msra.gmra.mxu1 %vm152_vm2, %v2574_v17 }
0x1ac9   :  { %3570 = vmatprep.mubr.msk.f32.mxu1 %vm3800_vm7, %v3799_v1 }
0x1b88   :  { %v3546_v29 = vpop.f32.mrf.mxu1 }
0x1b89   :  { %v2662_v30 = vadd.f32 %v3546_v29, %v3151_v28 }
0x1b8a   :  { %v2656_v31 = vpop.f32.mrf.mxu1 }
0x1b8b   :  { %v2668_v44 = vmul.f32 0.044715, %v2662_v30  ;;  %v2657_v32 = vadd.f32 %v3151_v28, %v2656_v31  ;;  %v2666_v46 = vmul.f32 0.5, %v2662_v30  ;;  %v2978_v31 = vld [vmem:[#allocation2 + $0x60] sm:$0xff] }
0x1b8d   :  { %v2670_v33 = vmul.f32 %v2668_v44, %v2662_v30  ;;  %v2667_v34 = vmul.f32 0.044715, %v2657_v32  ;;  %v2665_v45 = vmul.f32 0.5, %v2657_v32  ;;  %v2977_v44 = vld [vmem:[#allocation2 + $0x58] sm:$0xff] }
0x1b8f   :  { %v2672_v42 = vmul.f32 %v2670_v33, %v2662_v30  ;;  %v2669_v35 = vmul.f32 %v2667_v34, %v2657_v32  ;;  %v3160_v33 = vld [vmem:[#allocation2 + $0x12] ss:$0 sm:$0xff] }
0x1b91   :  { %v2674_v36 = vadd.f32 %v2672_v42, %v2662_v30  ;;  %v2671_v37 = vmul.f32 %v2669_v35, %v2657_v32  ;;  %v2979_v30 = vld [vmem:[#allocation2 + $0x68] sm:$0xff] }
0x1b93   :  { %v2676_v38 = vmul.f32 0.7978846, %v2674_v36  ;;  %v2673_v39 = vadd.f32 %v2671_v37, %v2657_v32  ;;  %v2976_v32 = vld [vmem:[#allocation2 + $0x50] sm:$0xff] }
0x1b94   :  { %v3162_v37 = vld [vmem:[#allocation2 + $0x13] ss:$0 sm:$0xff] }
0x1b95   :  { %3702 = vtanh.f32 %v2676_v38  ;;  %v2675_v40 = vmul.f32 0.7978846, %v2673_v39 }
0x1b97   :  { %3704 = vtanh.f32 %v2675_v40 }
0x1ba2   :  { %v3703_v41 = vpop.eup %3702 }
0x1ba3   :  { %v2680_v6 = vadd.f32 1.0, %v3703_v41 }
0x1ba4   :  { %v3705_v43 = vpop.eup %3704 }
0x1ba5   :  { %v2679_v24 = vadd.f32 1.0, %v3705_v43  ;;  %v2682_v23 = vmul.f32 %v2680_v6, %v2666_v46 }
0x1ba7   :  { %v2681_v9 = vmul.f32 %v2679_v24, %v2665_v45 }
0x1ba9   :  { %3563 = vmatprep.mubr.msk.f32.mxu0 %vm1384_vm6, %v2681_v9 }
0x1baa   :  { %3564 = vmatmul.mubr.msk.f32.vlgmr.msra.gmra.mxu0 %vm1384_vm6, %v2682_v23 }
0x1c6a   :  { %v3565_v48 = vpop.f32.mrf.mxu0 }
0x1c6b   :  { %v2774_v61 = vadd.f32 %v3565_v48, %v3154_v47 }
0x1c6c   :  { %v2768_v49 = vpop.f32.mrf.mxu0 }
0x1c6d   :  { %v2778_v59 = vadd.f32 %v2774_v61, %v2574_v17  ;;  %v2769_v50 = vadd.f32 %v3154_v47, %v2768_v49 }
0x1c6f   :  { %v2777_v51 = vadd.f32 %v2769_v50, %v2573_v16  ;;  %v2784_v52 = vsel %vm152_vm2, %v2778_v59, 0.0 }
0x1c70   :  { %2785 = vadd.xlane.f32.xlu0 %v2784_v52 }
0x1c71   :  { %v2781_v53 = vsel %vm152_vm2, %v2777_v51, 0.0 }
0x1c72   :  { %2782 = vadd.xlane.f32.xlu1 %v2781_v53 }
0x1cf9   :  { %v2786_v54 = vpop.xlane.xlu0 %2785 }
0x1cfa   :  { %v2788_v55 = vmul.f32 0.03125, %v2786_v54 }
0x1cfb   :  { %v2783_v56 = vpop.xlane.xlu1 %2782 }
0x1cfc   :  { %v2790_v15 = vsub.f32 %v2778_v59, %v2788_v55  ;;  %v2787_v14 = vmul.f32 0.03125, %v2783_v56 }
0x1cfe   :  { %v2789_v57 = vsub.f32 %v2777_v51, %v2787_v14  ;;  %v2792_v58 = vmul.f32 %v2790_v15, %v2790_v15 }
0x1d00   :  { %v2796_v60 = vsel %vm152_vm2, %v2792_v58, 0.0  ;;  %v2791_v62 = vmul.f32 %v2789_v57, %v2789_v57 }
0x1d01   :  { %2797 = vadd.xlane.f32.xlu0 %v2796_v60 }
0x1d02   :  { %v2793_v63 = vsel %vm152_vm2, %v2791_v62, 0.0 }
0x1d03   :  { %2794 = vadd.xlane.f32.xlu1 %v2793_v63 }
0x1d8a   :  { %v2798_v3 = vpop.xlane.xlu0 %2797 }
0x1d8b   :  { %v2800_v4 = vmul.f32 0.03125, %v2798_v3 }
0x1d8c   :  { %v2795_v5 = vpop.xlane.xlu1 %2794 }
0x1d8d   :  { %v2802_v7 = vadd.f32 1e-12, %v2800_v4  ;;  %v2799_v8 = vmul.f32 0.03125, %v2795_v5 }
0x1d8f   :  { %3706 = vrsqrt.f32 %v2802_v7  ;;  %v2801_v10 = vadd.f32 1e-12, %v2799_v8 }
0x1d91   :  { %3708 = vrsqrt.f32 %v2801_v10 }
0x1d9c   :  { %v3707_v2 = vpop.eup %3706 }
0x1d9d   :  { %v2806_v0 = vmul.f32 %v3707_v2, %v2790_v15 }
0x1d9e   :  { %v3709_v12 = vpop.eup %3708 }
0x1d9f   :  { %v2812_v16 = vmul.f32 %v3157_v11, %v2806_v0  ;;  %v2805_v17 = vmul.f32 %v3709_v12, %v2789_v57 }
0x1da1   :  { %v2818_v19 = vadd.f32 %v3158_v13, %v2812_v16  ;;  %v2811_v21 = vmul.f32 %v3157_v11, %v2805_v17 }
0x1da3   :  { %3567 = vmatpush3.msra.mxu1 %v2818_v19  ;;  %v2817_v20 = vadd.f32 %v3158_v13, %v2811_v21 }
0x1da4   :  { %3568 = vmatprep.subr.mxu1 %v3799_v1 }
0x1da5   :  { %3569 = vmatpush3.msra.mxu1 %v2817_v20 }
0x1da6   :  { %3571 = vmatmul.mubr.msk.f32.vlgmr.msra.gmra.mxu1 %vm378_vm4, %v2819_v22  ;;  %3573 = vmatprep.subr.mxu1 %v3799_v1 }
0x1da7   :  { %3574 = vmatpush3.msra.mxu1 %v2896_v26  ;;  %3581 = vmatprep.mubr.msk.f32.mxu1 %vm3800_vm7, %v3799_v1 }
0x1da8   :  { %3575 = vmatprep.subr.mxu1 %v3799_v1 }
0x1da9   :  { %3576 = vmatpush3.msra.mxu1 %v2895_v18 }
0x1daa   :  { %3577 = vmatprep.subr.mxu1 %v3799_v1 }
0x1dab   :  { %3578 = vmatpush3.msra.mxu1 %v2894_v27 }
0x1dac   :  { %3579 = vmatprep.subr.mxu1 %v3799_v1 }
0x1dad   :  { %3580 = vmatpush3.msra.mxu1 %v2893_v25 }
0x1dae   :  { %3584 = vmatprep.subr.mxu1 %v3799_v1 }
0x1e66   :  { %v2889_v28 = vpop.f32.mrf.mxu1 }
0x1e67   :  { %3582 = vmatmul.mubr.msk.f32.vlgmr.msra.gmra.mxu1 %vm152_vm2, %v2889_v28 }
0x1e68   :  { %v3572_v29 = vpop.f32.mrf.mxu1  ;;  %3592 = vmatprep.mubr.msk.f32.mxu1 %vm3800_vm7, %v3799_v1  ;;  %3585 = vmatpush3.msra.mxu1 %v2979_v30 }
0x1e69   :  { %3586 = vmatprep.subr.mxu1 %v3799_v1 }
0x1e6a   :  { %3587 = vmatpush3.msra.mxu1 %v2978_v31 }
0x1e6b   :  { %3588 = vmatprep.subr.mxu1 %v3799_v1 }
0x1e6c   :  { %3589 = vmatpush3.msra.mxu1 %v2977_v44 }
0x1e6d   :  { %3590 = vmatprep.subr.mxu1 %v3799_v1 }
0x1e6e   :  { %3591 = vmatpush3.msra.mxu1 %v2976_v32 }
0x1f27   :  { %v2971_v34 = vpop.f32.mrf.mxu1 }
0x1f28   :  { %v2972_v42 = vadd.f32 %v3160_v33, %v2971_v34 }
0x1f29   :  { %v3583_v35 = vpop.f32.mrf.mxu1 }
0x1f2a   :  { %3710 = vtanh.f32 %v2972_v42 }
0x1f37   :  { %v3711_v36 = vpop.eup %3710 }
0x1f38   :  { %3593 = vmatmul.mubr.msk.f32.vlgmr.msra.gmra.mxu1 %vm152_vm2, %v3711_v36 }
0x1ff8   :  { %v3054_v38 = vpop.f32.mrf.mxu1 }
0x1ff9   :  { %v3055_v39 = vadd.f32 %v3162_v37, %v3054_v38 }
0x1ffa   :  { %v3594_v40 = vpop.f32.mrf.mxu1 }
0x1ffb   :  { %3058 = vst [vmem:[#allocation7] sm:$0xff] %v3055_v39 }
0x1ffc   :  { %3765 = shalt.err (!%p3762_p0)
}
0x1ffd   :  { %3068 = dma.vmem_to_hbm [thread:$0]  %s3066_s12, 128, %s4158_s3, [#allocation4]  }
0x1ffe   :  { %3778 = dma.done.wait [#allocation4], 128  }
0x1fff   :  { %3779 = vsyncadd [#allocation4], 4294967168 }
0x2000   :  { %3072 = vsyncpa [#allocation3], 1 }
0x2001   :  { %3073 = vsyncpa [#allocation6], 1 }
0x2002   :  { %3074 = vsyncpa [#allocation4], 1 }

</bundles_post_ra>
